<compile_context>
chip_gen: v6e
topology: v6e:2x2x1
jax: 0.10.0
libtpu: 0.0.40
codegen_flags: <defaults>
</compile_context>

<pallas_src>
import math

import jax
import jax.numpy as jnp
from jax.experimental import pallas as pl
from jax.experimental.pallas import tpu as pltpu


D_PAD = 128          # padded feature width (lane-dense)
NUM_LAYERS = 3


def _round_up(n, m):
    return ((n + m - 1) // m) * m


def _stable_softplus(x):
    # Numerically stable softplus (matches F.softplus for all rho).
    return jnp.maximum(x, 0.0) + jnp.log1p(jnp.exp(-jnp.abs(x)))


def _full_spec(shape):
    # grid=() -> index_map takes no args; full array resident in VMEM.
    return pl.BlockSpec(shape, lambda: (0,) * len(shape))


# ---------------------------------------------------------------------------
# One-time packing (init): transpose to [in,out], zero-pad to D_PAD, stack.
# Done once, NOT per forward call.
# ---------------------------------------------------------------------------
def pack_raw_params(params, d_pad=D_PAD):
    nl = len(params)
    wstack = jnp.zeros((3, nl, d_pad, d_pad), jnp.float32)  # mu/rho/eps
    bstack = jnp.zeros((3, nl, 1, d_pad), jnp.float32)
    names = (("w_mu", "b_mu"), ("w_rho", "b_rho"), ("w_eps", "b_eps"))
    for l, layer in enumerate(params):
        for c, (wn, bn) in enumerate(names):
            w = layer[wn]                      # [out, in] (PyTorch layout)
            out_f, in_f = w.shape
            wstack = wstack.at[c, l, :in_f, :out_f].set(jnp.transpose(w))
            bstack = bstack.at[c, l, 0, :out_f].set(layer[bn])
    # Padded eps entries are zero, so sampled padded weights/biases come out
    # exactly zero regardless of the mu/rho padding values.
    return wstack, bstack


# ---------------------------------------------------------------------------
# Per-noise-reset sampling kernel:  w = mu + softplus(rho) * eps
# ---------------------------------------------------------------------------
def sample_params_kernel(wstack_ref, bstack_ref, w_ref, b_ref):
    w_ref[...] = (wstack_ref[0]
                  + _stable_softplus(wstack_ref[1]) * wstack_ref[2])
    b_ref[...] = (bstack_ref[0]
                  + _stable_softplus(bstack_ref[1]) * bstack_ref[2])


def sample_params(wstack, bstack):
    """Run once per reset_noise(): produces packed sampled weights/biases."""
    _, nl, d, _ = wstack.shape
    n_elem = int(wstack.size + bstack.size)
    return pl.pallas_call(
        sample_params_kernel,
        out_shape=(jax.ShapeDtypeStruct((nl, d, d), jnp.float32),
                   jax.ShapeDtypeStruct((nl, 1, d), jnp.float32)),
        in_specs=[_full_spec(tuple(wstack.shape)),
                  _full_spec(tuple(bstack.shape))],
        out_specs=(_full_spec((nl, d, d)), _full_spec((nl, 1, d))),
        cost_estimate=pl.CostEstimate(
            flops=2 * n_elem,
            transcendentals=2 * (n_elem // 3),
            bytes_accessed=4 * (n_elem + nl * d * d + nl * d)),
    )(wstack, bstack)


# ---------------------------------------------------------------------------
# Per-step forward kernel: fused relu(x@W1+b1) -> relu(@W2+b2) -> @W3+b3
# ---------------------------------------------------------------------------
def _make_mlp_kernel(mm_dtype):
    def mlp_forward_kernel(x_ref, w_ref, b_ref, o_ref):
        nl = w_ref.shape[0]
        h = x_ref[...].astype(mm_dtype)
        out = None
        for l in range(nl):            # static unroll: 3 MXU matmuls
            z = jnp.dot(h, w_ref[l].astype(mm_dtype),
                        preferred_element_type=jnp.float32) + b_ref[l]
            if l < nl - 1:
                h = jnp.maximum(z, 0.0).astype(mm_dtype)
            else:
                out = z
        o_ref[...] = out.astype(o_ref.dtype)
    return mlp_forward_kernel


def bayes_backprop_dqn_forward(x, w, b, action_space, mm_dtype=jnp.float32):
    """Forward pass given already-sampled packed parameters.

    x: [B, input_dim] f32;  w: [3, D_PAD, D_PAD];  b: [3, 1, D_PAD].
    Returns [B, action_space] f32.  Wrap in jax.jit (action_space static) so
    the pad/slice glue fuses with the kernel dispatch in the RL loop.
    mm_dtype=jnp.bfloat16 enables full-rate MXU on v6e/v7x for large batches
    (accumulation stays f32).
    """
    B, in_dim = x.shape
    nl, d, _ = w.shape

    # Batch tile: full 128-row MXU tiles for real replay batches, a single
    # multiple-of-8 tile for tiny action-selection batches.
    tb = 128 if B >= 128 else _round_up(max(B, 1), 8)
    b_pad = _round_up(B, tb)
    # Zero-pad rows to the tile and features to the lane-dense width (exact).
    x_p = jnp.pad(x, ((0, b_pad - B), (0, d - in_dim)))

    out = pl.pallas_call(
        _make_mlp_kernel(mm_dtype),
        out_shape=jax.ShapeDtypeStruct((b_pad, d), jnp.float32),
        grid=(b_pad // tb,),
        in_specs=[
            pl.BlockSpec((tb, d), lambda i: (i, 0)),        # batch-tiled x
            pl.BlockSpec((nl, d, d), lambda i: (0, 0, 0)),  # resident weights
            pl.BlockSpec((nl, 1, d), lambda i: (0, 0, 0)),  # resident biases
        ],
        out_specs=pl.BlockSpec((tb, d), lambda i: (i, 0)),  # lane-dense store
        compiler_params=pltpu.CompilerParams(
            dimension_semantics=("parallel",)),             # v7x: 2 TCs
        cost_estimate=pl.CostEstimate(
            flops=2 * b_pad * d * d * nl,
            transcendentals=0,
            bytes_accessed=4 * (2 * b_pad * d + nl * d * d + nl * d)),
    )(x_p, w, b)
    return out[:B, :action_space]


# ---------------------------------------------------------------------------
# Synthetic params + pure-JAX reference
# ---------------------------------------------------------------------------
def make_bayes_linear_params(key, in_features, out_features):
    """Deterministic synthetic init mirroring a BayesBackpropLinear layer."""
    k_wmu, k_bmu, k_weps, k_beps = jax.random.split(key, 4)
    bound = 1.0 / math.sqrt(in_features)
    return {
        "w_mu": jax.random.uniform(k_wmu, (out_features, in_features),
                                   jnp.float32, -bound, bound),
        "w_rho": jnp.full((out_features, in_features), -3.0, jnp.float32),
        "w_eps": jax.random.normal(k_weps, (out_features, in_features),
                                   jnp.float32),
        "b_mu": jax.random.uniform(k_bmu, (out_features,),
                                   jnp.float32, -bound, bound),
        "b_rho": jnp.full((out_features,), -3.0, jnp.float32),
        "b_eps": jax.random.normal(k_beps, (out_features,), jnp.float32),
    }


def reference_forward(x, params):
    """Pure-JAX reference for the same forward pass."""
    h = x
    for i, layer in enumerate(params):
        w = layer["w_mu"] + _stable_softplus(layer["w_rho"]) * layer["w_eps"]
        b = layer["b_mu"] + _stable_softplus(layer["b_rho"]) * layer["b_eps"]
        h = h @ w.T + b
        if i < len(params) - 1:
            h = jnp.maximum(h, 0.0)
    return h


if __name__ == "__main__":
    # Shapes consistent with the module: input_dim=8, hidden=16,
    # action_space=4, batch=2.
    input_dim, hidden, action_space, batch = 8, 16, 4, 2

    key = jax.random.PRNGKey(0)
    k_x, k1, k2, k3 = jax.random.split(key, 4)

    x = jax.random.normal(k_x, (batch, input_dim), jnp.float32)
    params = [
        make_bayes_linear_params(k1, input_dim, hidden),    # fc1
        make_bayes_linear_params(k2, hidden, hidden),       # fc2
        make_bayes_linear_params(k3, hidden, action_space), # fc3
    ]

    # Init-time packing (once) + per-noise-reset sampling (Pallas kernel).
    wstack, bstack = pack_raw_params(params)
    w_s, b_s = jax.block_until_ready(sample_params(wstack, bstack))

    # Per-step forward (jitted so pad/slice glue fuses with the kernel call).
    forward = jax.jit(bayes_backprop_dqn_forward, static_argnums=(3,))
    out = jax.block_until_ready(forward(x, w_s, b_s, action_space))

    ref = reference_forward(x, params)
    assert out.shape == (batch, action_space)
    assert jnp.allclose(out, ref, atol=1e-5, rtol=1e-5), (
        float(jnp.max(jnp.abs(out - ref))))

    # TODO(synk): reset_noise()'s RNG draw and get_reg()'s KL divergence are
    # training-time utilities outside forward(); eps enters via the packed
    # stacks and resampling maps to re-running sample_params on new eps.

    print("KERNEL_OK")
</pallas_src>

<mosaic_0001>
module attributes {stable_mosaic.version = 11 : i64} {
  func.func @sample_params_kernel(%arg0: memref<3x3x128x128xf32, #tpu.memory_space<vmem>>, %arg1: memref<3x3x1x128xf32, #tpu.memory_space<vmem>>, %arg2: memref<3x128x128xf32, #tpu.memory_space<vmem>>, %arg3: memref<3x1x128xf32, #tpu.memory_space<vmem>>) attributes {dimension_semantics = [], scalar_prefetch = 0 : i64, scratch_operands = 0 : i64, tpu.core_type = #tpu.core_type<tc>} {
    %c0 = arith.constant 0 : index
    %c0_0 = arith.constant 0 : index
    %c0_1 = arith.constant 0 : index
    %c0_2 = arith.constant 0 : index
    %0 = vector.load %arg0[%c0, %c0_0, %c0_1, %c0_2] : memref<3x3x128x128xf32, #tpu.memory_space<vmem>>, vector<1x3x128x128xf32>
    %1 = vector.shape_cast %0 : vector<1x3x128x128xf32> to vector<3x128x128xf32>
    %c1 = arith.constant 1 : index
    %c0_3 = arith.constant 0 : index
    %c0_4 = arith.constant 0 : index
    %c0_5 = arith.constant 0 : index
    %2 = vector.load %arg0[%c1, %c0_3, %c0_4, %c0_5] : memref<3x3x128x128xf32, #tpu.memory_space<vmem>>, vector<1x3x128x128xf32>
    %3 = vector.shape_cast %2 : vector<1x3x128x128xf32> to vector<3x128x128xf32>
    %cst = arith.constant 0.000000e+00 : f32
    %4 = vector.broadcast %cst : f32 to vector<3x128x128xf32>
    %5 = arith.maximumf %3, %4 : vector<3x128x128xf32>
    %6 = math.absf %3 : vector<3x128x128xf32>
    %cst_6 = arith.constant 0.000000e+00 : f32
    %7 = vector.broadcast %cst_6 : f32 to vector<3x128x128xf32>
    %8 = arith.subf %7, %6 : vector<3x128x128xf32>
    %9 = math.exp %8 : vector<3x128x128xf32>
    %10 = math.log1p %9 : vector<3x128x128xf32>
    %11 = arith.addf %5, %10 : vector<3x128x128xf32>
    %c2 = arith.constant 2 : index
    %c0_7 = arith.constant 0 : index
    %c0_8 = arith.constant 0 : index
    %c0_9 = arith.constant 0 : index
    %12 = vector.load %arg0[%c2, %c0_7, %c0_8, %c0_9] : memref<3x3x128x128xf32, #tpu.memory_space<vmem>>, vector<1x3x128x128xf32>
    %13 = vector.shape_cast %12 : vector<1x3x128x128xf32> to vector<3x128x128xf32>
    %14 = arith.mulf %11, %13 : vector<3x128x128xf32>
    %15 = arith.addf %1, %14 : vector<3x128x128xf32>
    %c0_10 = arith.constant 0 : index
    %c0_11 = arith.constant 0 : index
    %c0_12 = arith.constant 0 : index
    %16 = vector.load %arg2[%c0_10, %c0_11, %c0_12] : memref<3x128x128xf32, #tpu.memory_space<vmem>>, vector<3x128x128xf32>
    tpu.vector_store %arg2[%c0_10, %c0_11, %c0_12], %15 {strides = array<i32>} : memref<3x128x128xf32, #tpu.memory_space<vmem>>, vector<3x128x128xf32>,
    %c0_13 = arith.constant 0 : index
    %c0_14 = arith.constant 0 : index
    %c0_15 = arith.constant 0 : index
    %c0_16 = arith.constant 0 : index
    %17 = vector.load %arg1[%c0_13, %c0_14, %c0_15, %c0_16] : memref<3x3x1x128xf32, #tpu.memory_space<vmem>>, vector<1x3x1x128xf32>
    %18 = vector.shape_cast %17 : vector<1x3x1x128xf32> to vector<3x1x128xf32>
    %c1_17 = arith.constant 1 : index
    %c0_18 = arith.constant 0 : index
    %c0_19 = arith.constant 0 : index
    %c0_20 = arith.constant 0 : index
    %19 = vector.load %arg1[%c1_17, %c0_18, %c0_19, %c0_20] : memref<3x3x1x128xf32, #tpu.memory_space<vmem>>, vector<1x3x1x128xf32>
    %20 = vector.shape_cast %19 : vector<1x3x1x128xf32> to vector<3x1x128xf32>
    %cst_21 = arith.constant 0.000000e+00 : f32
    %21 = vector.broadcast %cst_21 : f32 to vector<3x1x128xf32>
    %22 = arith.maximumf %20, %21 : vector<3x1x128xf32>
    %23 = math.absf %20 : vector<3x1x128xf32>
    %cst_22 = arith.constant 0.000000e+00 : f32
    %24 = vector.broadcast %cst_22 : f32 to vector<3x1x128xf32>
    %25 = arith.subf %24, %23 : vector<3x1x128xf32>
    %26 = math.exp %25 : vector<3x1x128xf32>
    %27 = math.log1p %26 : vector<3x1x128xf32>
    %28 = arith.addf %22, %27 : vector<3x1x128xf32>
    %c2_23 = arith.constant 2 : index
    %c0_24 = arith.constant 0 : index
    %c0_25 = arith.constant 0 : index
    %c0_26 = arith.constant 0 : index
    %29 = vector.load %arg1[%c2_23, %c0_24, %c0_25, %c0_26] : memref<3x3x1x128xf32, #tpu.memory_space<vmem>>, vector<1x3x1x128xf32>
    %30 = vector.shape_cast %29 : vector<1x3x1x128xf32> to vector<3x1x128xf32>
    %31 = arith.mulf %28, %30 : vector<3x1x128xf32>
    %32 = arith.addf %18, %31 : vector<3x1x128xf32>
    %c0_27 = arith.constant 0 : index
    %c0_28 = arith.constant 0 : index
    %c0_29 = arith.constant 0 : index
    %33 = vector.load %arg3[%c0_27, %c0_28, %c0_29] : memref<3x1x128xf32, #tpu.memory_space<vmem>>, vector<3x1x128xf32>
    tpu.vector_store %arg3[%c0_27, %c0_28, %c0_29], %32 {strides = array<i32>} : memref<3x1x128xf32, #tpu.memory_space<vmem>>, vector<3x1x128xf32>,
    return
  }
}

</mosaic_0001>

<bundles_post_ra>
// kernel: tpu_custom_call.1
= control target key start
LH: loop header
LB: loop body
LE: loop exit
PB: predicated region body
PF: predicated region fallthrough
CT: control target
= control target key end

     0   :  { %9 = vsyncpa [#allocation3], 0  ;;  %s2291_s0 = inlined_call_operand.hbm [shape: f32[3,3,128,128], index: 0, kind: input, shape index: {}]   ;;  %s2292_s1 = inlined_call_operand.hbm [shape: f32[3,3,1,128], index: 1, kind: input, shape index: {}]   ;;  %s2293_s2 = inlined_call_operand.hbm [shape: f32[3,128,128], index: 2, kind: output, shape index: {0}]   ;;  %s2294_s3 = inlined_call_operand.hbm [shape: f32[3,1,128], index: 3, kind: output, shape index: {1}]  }
   0x1   :  { %10 = vsyncpa [#allocation6], 0 }
   0x2   :  { %11 = vsyncpa [#allocation4], 0 }
   0x3   :  { %12 = vsyncpa [#allocation9], 0  ;;  %s1452_s12 = smov [#allocation2]  }
   0x4   :  { %s18_s13 = sshll.u32 %s1452_s12, 4  ;;  %s19_s13 = int_to_ptr.vmem [resolvable:$true] %s18_s13 }
   0x5   :  { %s1372_s14 = scalar_lea.vmem %s19_s13, 18432  ;;  %p1377_p1 = scmp.lt.s32.totalorder %s19_s13, %s19_s13 }
   0x6   :  { %p1373_p0 = scmp.ne.s32.totalorder %s19_s13, %s1372_s14  ;;  %p1378_p2 = scmp.lt.s32.totalorder %s1372_s14, %s1372_s14 }
   0x8   :  { %p1379_p3 = por %p1378_p2, %p1377_p1 }
   0xa   :  { %p1380_p4 = pnand %p1379_p3, %p1373_p0 }
   0xc   :  { %1383 = shalt.err (!%p1380_p4)
}
   0xd   :  { %s1453_s15 = smov 128   ;;  %s1454_s16 = smov 8  }
   0xe   :  { %24 = dma.hbm_to_vmem [thread:$0]  %s2291_s0, 18432, %s19_s13, [#allocation3], %s1453_s15, %s1453_s15, %s1454_s16  }
   0xf   :  { %s1455_s19 = smov [#allocation5]  }
  0x10   :  { %s30_s20 = sshll.u32 %s1455_s19, 4  ;;  %s31_s20 = int_to_ptr.vmem [resolvable:$true] %s30_s20 }
  0x11   :  { %s1392_s21 = scalar_lea.vmem %s31_s20, 144  ;;  %s1396_s22 = scalar_lea.vmem %s31_s20, 160 }
  0x12   :  { %p1393_p5 = scmp.ne.s32.totalorder %s31_s20, %s1392_s21  ;;  %p1397_p6 = scmp.lt.s32.totalorder %s31_s20, %s31_s20 }
  0x13   :  { %p1398_p7 = scmp.lt.s32.totalorder %s1396_s22, %s1392_s21 }
  0x15   :  { %p1399_p8 = por %p1398_p7, %p1397_p6 }
  0x17   :  { %p1400_p9 = pnand %p1399_p8, %p1393_p5 }
  0x19   :  { %1403 = shalt.err (!%p1400_p9)
}
  0x1a   :  { %s1456_s23 = smov 16   ;;  %s1457_s24 = smov 1  }
  0x1b   :  { %36 = dma.hbm_to_vmem [thread:$0]  %s2292_s1, 144, %s31_s20, [#allocation6], %s1456_s23, %s1456_s23, %s1457_s24  }
  0x1c   :  { %1444 = dma.done.wait [#allocation3], 18432  }
  0x1d   :  { %1445 = vsyncadd [#allocation3], 4294948864 }
  0x1e   :  { %1446 = dma.done.wait [#allocation6], 144  }
  0x1f   :  { %1447 = vsyncadd [#allocation6], 4294967152  ;;  %v1492_v0 = vld [vmem:[#allocation2 + $0x180] sm:$0xff]  ;;  %v1495_v2 = vld [vmem:[#allocation2 + $0x188] sm:$0xff]  ;;  %s1458_s0 = smov [#allocation7]  }
  0x20   :  { %v188_v1 = vand.u32 2147483647, %v1492_v0  ;;  %v189_v3 = vand.u32 2147483647, %v1495_v2  ;;  %v1498_v4 = vld [vmem:[#allocation2 + $0x190] sm:$0xff]  ;;  %v1501_v7 = vld [vmem:[#allocation2 + $0x198] sm:$0xff] }
  0x21   :  { %v190_v6 = vand.u32 2147483647, %v1498_v4  ;;  %v191_v9 = vand.u32 2147483647, %v1501_v7  ;;  %v1504_v12 = vld [vmem:[#allocation2 + $0x1a0] sm:$0xff]  ;;  %v1507_v17 = vld [vmem:[#allocation2 + $0x1a8] sm:$0xff] }
  0x22   :  { %v236_v5 = vsub.f32 0.0, %v188_v1  ;;  %v237_v8 = vsub.f32 0.0, %v189_v3  ;;  %v192_v15 = vand.u32 2147483647, %v1504_v12  ;;  %v1509_v20 = vld [vmem:[#allocation2 + $0x1b0] sm:$0xff]  ;;  %v1513_v24 = vld [vmem:[#allocation2 + $0x1b8] sm:$0xff] }
  0x23   :  { %v238_v11 = vsub.f32 0.0, %v190_v6  ;;  %v239_v14 = vsub.f32 0.0, %v191_v9  ;;  %v193_v21 = vand.u32 2147483647, %v1507_v17  ;;  %v194_v22 = vand.u32 2147483647, %v1509_v20 }
  0x24   :  { %v284_v10 = vmul.f32 1.442695, %v236_v5  ;;  %v286_v13 = vmul.f32 1.442695, %v237_v8  ;;  %v240_v19 = vsub.f32 0.0, %v192_v15  ;;  %v1516_v28 = vld [vmem:[#allocation2 + $0x1c0] sm:$0xff] }
  0x25   :  { %v288_v16 = vmul.f32 1.442695, %v238_v11  ;;  %v290_v18 = vmul.f32 1.442695, %v239_v14  ;;  %v241_v25 = vsub.f32 0.0, %v193_v21  ;;  %v242_v26 = vsub.f32 0.0, %v194_v22 }
  0x26   :  { %1160 = vpow2.f32 %v284_v10  ;;  %v292_v23 = vmul.f32 1.442695, %v240_v19  ;;  %v195_v27 = vand.u32 2147483647, %v1513_v24  ;;  %v196_v29 = vand.u32 2147483647, %v1516_v28 }
  0x27   :  { %1162 = vpow2.f32 %v286_v13  ;;  %v1519_v30 = vld [vmem:[#allocation2 + $0x1c8] sm:$0xff]  ;;  %v294_v31 = vmul.f32 1.442695, %v241_v25  ;;  %v296_v32 = vmul.f32 1.442695, %v242_v26  ;;  %v1522_v36 = vld [vmem:[#allocation2 + $0x1d0] sm:$0xff] }
  0x28   :  { %1164 = vpow2.f32 %v288_v16  ;;  %v243_v33 = vsub.f32 0.0, %v195_v27  ;;  %v244_v34 = vsub.f32 0.0, %v196_v29  ;;  %v197_v35 = vand.u32 2147483647, %v1519_v30  ;;  %v1525_v41 = vld [vmem:[#allocation2 + $0x1d8] sm:$0xff]  ;;  %v1533_v51 = vld [vmem:[#allocation2 + $0x1e0] sm:$0xff] }
  0x29   :  { %1166 = vpow2.f32 %v290_v18  ;;  %v198_v38 = vand.u32 2147483647, %v1522_v36  ;;  %v140_v42 = vmax.f32 %v1492_v0, 0.0  ;;  %v141_v43 = vmax.f32 %v1495_v2, 0.0  ;;  %v1541_v9 = vld [vmem:[#allocation2 + $0x1e8] sm:$0xff]  ;;  %s1123_s1 = sshll.u32 %s1458_s0, 4  ;;  %s1124_s1 = int_to_ptr.vmem [resolvable:$true] %s1123_s1 }
  0x2a   :  { %1168 = vpow2.f32 %v292_v23  ;;  %v298_v37 = vmul.f32 1.442695, %v243_v33  ;;  %v300_v39 = vmul.f32 1.442695, %v244_v34  ;;  %v245_v40 = vsub.f32 0.0, %v197_v35  ;;  %s1404_s27 = scalar_lea.vmem %s1124_s1, 6144  ;;  %p1409_p11 = scmp.lt.s32.totalorder %s1124_s1, %s1124_s1 }
  0x2b   :  { %1170 = vpow2.f32 %v294_v31  ;;  %v246_v44 = vsub.f32 0.0, %v198_v38  ;;  %v142_v45 = vmax.f32 %v1498_v4, 0.0  ;;  %v143_v46 = vmax.f32 %v1501_v7, 0.0  ;;  %p1405_p10 = scmp.ne.s32.totalorder %s1124_s1, %s1404_s27  ;;  %p1410_p12 = scmp.lt.s32.totalorder %s1404_s27, %s1404_s27 }
  0x2c   :  { %1172 = vpow2.f32 %v296_v32  ;;  %v302_v47 = vmul.f32 1.442695, %v245_v40  ;;  %v144_v48 = vmax.f32 %v1504_v12, 0.0  ;;  %v199_v50 = vand.u32 2147483647, %v1525_v41 }
  0x2d   :  { %1174 = vpow2.f32 %v298_v37  ;;  %v304_v49 = vmul.f32 1.442695, %v246_v44  ;;  %v145_v53 = vmax.f32 %v1507_v17, 0.0  ;;  %v146_v54 = vmax.f32 %v1509_v20, 0.0  ;;  %v868_v20 = vld [vmem:[#allocation2 + $0x338] sm:$0xff]  ;;  %p1411_p13 = por %p1410_p12, %p1409_p11 }
  0x2e   :  { %1176 = vpow2.f32 %v300_v39  ;;  %v147_v55 = vmax.f32 %v1513_v24, 0.0  ;;  %v148_v59 = vmax.f32 %v1516_v28, 0.0  ;;  %v149_v60 = vmax.f32 %v1519_v30, 0.0 }
  0x2f   :  { %1178 = vpow2.f32 %v302_v47  ;;  %v200_v1 = vand.u32 2147483647, %v1533_v51  ;;  %v247_v8 = vsub.f32 0.0, %v199_v50  ;;  %v201_v23 = vand.u32 2147483647, %v1541_v9  ;;  %v864_v47 = vld [vmem:[#allocation2 + $0x318] sm:$0xff]  ;;  %p1412_p0 = pnand %p1411_p13, %p1405_p10 }
  0x30   :  { %1180 = vpow2.f32 %v304_v49  ;;  %v2317_v30 = vmax.f32 %v1522_v36, 0.0 }
  0x31   :  { %v1544_v22 = vsub.f32 0.0, %v200_v1  ;;  %v1547_v27 = vmul.f32 1.442695, %v247_v8 }
  0x33   :  { %v1161_v52 = vpop.eup %1160 }
  0x34   :  { %v1163_v56 = vpop.eup %1162  ;;  %v380_v57 = vadd.f32 1.0, %v1161_v52  ;;  %v383_v58 = vmul.f32 -0.5, %v1161_v52  ;;  %v386_v5 = vand.u32 2147483647, %v1161_v52 }
  0x35   :  { %v1165_v61 = vpop.eup %1164  ;;  %v389_v62 = vadd.f32 1.0, %v1163_v56  ;;  %v392_v63 = vmul.f32 -0.5, %v1163_v56  ;;  %v395_v15 = vand.u32 2147483647, %v1163_v56 }
  0x36   :  { %v1167_v3 = vpop.eup %1166  ;;  %1182 = vlog2.f32 %v380_v57  ;;  %v398_v6 = vadd.f32 1.0, %v1165_v61  ;;  %v384_v10 = vadd.f32 1.0, %v383_v58  ;;  %v401_v13 = vmul.f32 -0.5, %v1165_v61 }
  0x37   :  { %1184 = vlog2.f32 %v389_v62  ;;  %v393_v11 = vadd.f32 1.0, %v392_v63  ;;  %v1169_v14 = vpop.eup %1168  ;;  %v407_v16 = vadd.f32 1.0, %v1167_v3  ;;  %v404_v19 = vand.u32 2147483647, %v1165_v61 }
  0x38   :  { %1186 = vlog2.f32 %v398_v6  ;;  %v410_v21 = vmul.f32 -0.5, %v1167_v3  ;;  %v416_v25 = vadd.f32 1.0, %v1169_v14  ;;  %v419_v26 = vmul.f32 -0.5, %v1169_v14  ;;  %v1171_v29 = vpop.eup %1170 }
  0x39   :  { %1188 = vlog2.f32 %v407_v16  ;;  %v385_v31 = vmul.f32 %v1161_v52, %v384_v10  ;;  %vm1549_vm0 = vcmp.lt.f32.partialorder %v386_v5, 0.0004427343  ;;  %v1553_v33 = vmul.f32 %v1163_v56, %v393_v11  ;;  %v1173_v35 = vpop.eup %1172 }
  0x3a   :  { %v402_v34 = vadd.f32 1.0, %v401_v13  ;;  %vm1555_vm1 = vcmp.lt.f32.partialorder %v395_v15, 0.0004427343  ;;  %v413_v38 = vand.u32 2147483647, %v1167_v3  ;;  %1190 = vlog2.f32 %v416_v25  ;;  %v1175_v44 = vpop.eup %1174 }
  0x3b   :  { %v425_v39 = vadd.f32 1.0, %v1171_v29  ;;  %v428_v40 = vmul.f32 -0.5, %v1171_v29  ;;  %vm1559_vm2 = vcmp.lt.f32.partialorder %v404_v19, 0.0004427343  ;;  %v411_v49 = vadd.f32 1.0, %v410_v21  ;;  %v1177_v56 = vpop.eup %1176 }
  0x3c   :  { %v422_v50 = vand.u32 2147483647, %v1169_v14  ;;  %v434_v52 = vadd.f32 1.0, %v1173_v35  ;;  %v420_v57 = vadd.f32 1.0, %v419_v26  ;;  %v437_v62 = vmul.f32 -0.5, %v1173_v35  ;;  %v1563_v6 = vpop.eup %1178 }
  0x3d   :  { %1192 = vlog2.f32 %v425_v39  ;;  %v429_v58 = vadd.f32 1.0, %v428_v40  ;;  %v403_v63 = vmul.f32 %v1165_v61, %v402_v34  ;;  %v431_v1 = vand.u32 2147483647, %v1171_v29  ;;  %v1569_v21 = vpop.eup %1180 }
  0x3e   :  { %1194 = vlog2.f32 %v434_v52  ;;  %v443_v5 = vadd.f32 1.0, %v1175_v44  ;;  %vm1565_vm3 = vcmp.lt.f32.partialorder %v413_v38, 0.0004427343  ;;  %v438_v10 = vadd.f32 1.0, %v437_v62 }
  0x3f   :  { %v440_v11 = vand.u32 2147483647, %v1173_v35  ;;  %v446_v13 = vmul.f32 -0.5, %v1175_v44  ;;  %v412_v15 = vmul.f32 %v1167_v3, %v411_v49  ;;  %v452_v16 = vadd.f32 1.0, %v1177_v56 }
  0x40   :  { %1196 = vlog2.f32 %v443_v5  ;;  %v455_v19 = vmul.f32 -0.5, %v1177_v56  ;;  %v1571_v25 = vmul.f32 %v1169_v14, %v420_v57  ;;  %vm1573_vm4 = vcmp.lt.f32.partialorder %v422_v50, 0.0004427343 }
  0x41   :  { %v1577_v26 = vmul.f32 %v1171_v29, %v429_v58  ;;  %v447_v34 = vadd.f32 1.0, %v446_v13  ;;  %vm1579_vm5 = vcmp.lt.f32.partialorder %v431_v1, 0.0004427343  ;;  %v449_v3 = vand.u32 2147483647, %v1175_v44 }
  0x42   :  { %1198 = vlog2.f32 %v452_v16  ;;  %v461_v40 = vadd.f32 1.0, %v1563_v6  ;;  %v464_v49 = vmul.f32 -0.5, %v1563_v6  ;;  %v1585_v50 = vmul.f32 %v1173_v35, %v438_v10  ;;  %v861_v16 = vld [vmem:[#allocation2 + $0x300] sm:$0xff] }
  0x43   :  { %v1183_v38 = vpop.eup %1182  ;;  %vm1587_vm6 = vcmp.lt.f32.partialorder %v440_v11, 0.0004427343  ;;  %v458_v29 = vand.u32 2147483647, %v1177_v56  ;;  %v1591_v1 = vmul.f32 %v1175_v44, %v447_v34  ;;  %v456_v5 = vadd.f32 1.0, %v455_v19  ;;  %v862_v34 = vld [vmem:[#allocation2 + $0x308] sm:$0xff] }
  0x44   :  { %v1185_v14 = vpop.eup %1184  ;;  %v382_v52 = vmul.f32 0.6931472, %v1183_v38  ;;  %1200 = vlog2.f32 %v461_v40  ;;  %v467_v38 = vand.u32 2147483647, %v1563_v6  ;;  %v470_v35 = vadd.f32 1.0, %v1569_v21  ;;  %v43_v40 = vld [vmem:[#allocation2] sm:$0xff] }
  0x45   :  { %v1187_v58 = vpop.eup %1186  ;;  %v391_v62 = vmul.f32 0.6931472, %v1185_v14  ;;  %vm1602_vm7 = vcmp.lt.f32.partialorder %v449_v3, 0.0004427343  ;;  %v473_v32 = vmul.f32 -0.5, %v1569_v21  ;;  %v50_v19 = vld [vmem:[#allocation2 + $0x38] sm:$0xff] }
  0x46   :  { %v388_v13 = vsel %vm1549_vm0, %v385_v31, %v382_v52  ;;  %v400_v18 = vmul.f32 0.6931472, %v1187_v58  ;;  %v1189_v10 = vpop.eup %1188  ;;  %v465_v31 = vadd.f32 1.0, %v464_v49  ;;  %1202 = vlog2.f32 %v470_v35  ;;  %v44_v58 = vld [vmem:[#allocation2 + $0x8] sm:$0xff]  ;;  %v865_v35 = vld [vmem:[#allocation2 + $0x320] sm:$0xff] }
  0x47   :  { %v812_v11 = vadd.f32 %v388_v13, %v140_v42  ;;  %v397_v44 = vsel %vm1555_vm1, %v1553_v33, %v391_v62  ;;  %v863_v42 = vld [vmem:[#allocation2 + $0x310] sm:$0xff]  ;;  %v409_v52 = vmul.f32 0.6931472, %v1189_v10  ;;  %v1191_v37 = vpop.eup %1190  ;;  %v1613_v62 = vmul.f32 %v1177_v56, %v456_v5 }
  0x48   :  { %v813_v14 = vadd.f32 %v397_v44, %v141_v43  ;;  %v406_v0 = vsel %vm1559_vm2, %v403_v63, %v400_v18  ;;  %vm1615_vm8 = vcmp.lt.f32.partialorder %v458_v29, 0.0004427343  ;;  %v45_v43 = vld [vmem:[#allocation2 + $0x10] sm:$0xff]  ;;  %v418_v63 = vmul.f32 0.6931472, %v1191_v37 }
  0x49   :  { %v909_v33 = vmul.f32 %v861_v16, %v812_v11  ;;  %v814_v3 = vadd.f32 %v406_v0, %v142_v45  ;;  %v415_v18 = vsel %vm1565_vm3, %v412_v15, %v409_v52  ;;  %vm1621_vm9 = vcmp.lt.f32.partialorder %v467_v38, 0.0004427343  ;;  %v46_v15 = vld [vmem:[#allocation2 + $0x18] sm:$0xff]  ;;  %v48_v52 = vld [vmem:[#allocation2 + $0x28] sm:$0xff] }
  0x4a   :  { %v910_v2 = vmul.f32 %v862_v34, %v813_v14  ;;  %1204 = vpow2.f32 %v1547_v27  ;;  %v1193_v4 = vpop.eup %1192  ;;  %v815_v29 = vadd.f32 %v415_v18, %v143_v46  ;;  %v1629_v5 = vmul.f32 %v1563_v6, %v465_v31  ;;  %v47_v34 = vld [vmem:[#allocation2 + $0x20] sm:$0xff]  ;;  %v866_v46 = vld [vmem:[#allocation2 + $0x328] sm:$0xff]  ;;  %v1643_v14 = vld [vmem:[#allocation2 + $0x1f0] sm:$0xff] }
  0x4b   :  { %v957_v45 = vadd.f32 %v909_v33, %v43_v40  ;;  %v911_v56 = vmul.f32 %v863_v42, %v814_v3  ;;  %v1195_v16 = vpop.eup %1194  ;;  %v424_v38 = vsel %vm1573_vm4, %v1571_v25, %v418_v63  ;;  %v427_v10 = vmul.f32 0.6931472, %v1193_v4  ;;  %v49_v3 = vld [vmem:[#allocation2 + $0x30] sm:$0xff]  ;;  %v1659_v18 = vld [vmem:[#allocation2 + $0x200] sm:$0xff] }
  0x4c   :  { %v958_v8 = vadd.f32 %v910_v2, %v44_v58  ;;  %v474_v11 = vadd.f32 1.0, %v473_v32  ;;  %v912_v44 = vmul.f32 %v864_v47, %v815_v29  ;;  %v816_v7 = vadd.f32 %v424_v38, %v144_v48  ;;  %v51_v38 = vld [vmem:[#allocation2 + $0x40] sm:$0xff] }
  0x4d   :  { %1005 = vst [vmem:[#allocation7] sm:$0xff] %v957_v45  ;;  %v959_v27 = vadd.f32 %v911_v56, %v45_v43  ;;  %v436_v6 = vmul.f32 0.6931472, %v1195_v16  ;;  %v1197_v31 = vpop.eup %1196  ;;  %v433_v40 = vsel %vm1579_vm5, %v1577_v26, %v427_v10  ;;  %v476_v25 = vand.u32 2147483647, %v1569_v21  ;;  %v867_v26 = vld [vmem:[#allocation2 + $0x330] sm:$0xff] }
  0x4e   :  { %1006 = vst [vmem:[#allocation7 + $0x8] sm:$0xff] %v958_v8  ;;  %v308_v61 = vmul.f32 1.442695, %v1544_v22  ;;  %v249_v32 = vsub.f32 0.0, %v201_v23  ;;  %v960_v12 = vadd.f32 %v912_v44, %v46_v15  ;;  %v913_v48 = vmul.f32 %v865_v35, %v816_v7  ;;  %v869_v45 = vld [vmem:[#allocation2 + $0x340] sm:$0xff]  ;;  %v52_v44 = vld [vmem:[#allocation2 + $0x48] sm:$0xff] }
  0x4f   :  { %1007 = vst [vmem:[#allocation7 + $0x10] sm:$0xff] %v959_v27  ;;  %v817_v0 = vadd.f32 %v433_v40, %v145_v53  ;;  %v442_v39 = vsel %vm1587_vm6, %v1585_v50, %v436_v6  ;;  %v1199_v42 = vpop.eup %1198  ;;  %v445_v37 = vmul.f32 0.6931472, %v1197_v31  ;;  %v202_v17 = vand.u32 2147483647, %v1643_v14  ;;  %v1653_v53 = vld [vmem:[#allocation2 + $0x1f8] sm:$0xff] }
  0x50   :  { %v818_v22 = vadd.f32 %v442_v39, %v146_v54  ;;  %1206 = vpow2.f32 %v308_v61  ;;  %v310_v23 = vmul.f32 1.442695, %v249_v32  ;;  %1008 = vst [vmem:[#allocation7 + $0x18] sm:$0xff] %v960_v12  ;;  %v961_v33 = vadd.f32 %v913_v48, %v47_v34  ;;  %v871_v6 = vld [vmem:[#allocation2 + $0x350] sm:$0xff]  ;;  %v1684_v40 = vld [vmem:[#allocation2 + $0x208] sm:$0xff] }
  0x51   :  { %v914_v58 = vmul.f32 %v866_v46, %v817_v0  ;;  %v454_v2 = vmul.f32 0.6931472, %v1199_v42  ;;  %v1201_v57 = vpop.eup %1200  ;;  %v451_v43 = vsel %vm1602_vm7, %v1591_v1, %v445_v37  ;;  %v475_v54 = vmul.f32 %v1569_v21, %v474_v11  ;;  %v53_v32 = vld [vmem:[#allocation2 + $0x50] sm:$0xff] }
  0x52   :  { %v915_v50 = vmul.f32 %v867_v26, %v818_v22  ;;  %1208 = vpow2.f32 %v310_v23  ;;  %1009 = vst [vmem:[#allocation7 + $0x20] sm:$0xff] %v961_v33  ;;  %v819_v63 = vadd.f32 %v451_v43, %v147_v55  ;;  %v463_v56 = vmul.f32 0.6931472, %v1201_v57  ;;  %v870_v55 = vld [vmem:[#allocation2 + $0x348] sm:$0xff]  ;;  %v1699_v57 = vld [vmem:[#allocation2 + $0x220] sm:$0xff] }
  0x53   :  { %v962_v47 = vadd.f32 %v914_v58, %v48_v52  ;;  %v460_v4 = vsel %vm1615_vm8, %v1613_v62, %v454_v2  ;;  %v250_v21 = vsub.f32 0.0, %v202_v17  ;;  %v203_v16 = vand.u32 2147483647, %v1653_v53  ;;  %v1203_v8 = vpop.eup %1202  ;;  %v1694_v52 = vld [vmem:[#allocation2 + $0x218] sm:$0xff] }
  0x54   :  { %v963_v29 = vadd.f32 %v915_v50, %v49_v3  ;;  %v820_v1 = vadd.f32 %v460_v4, %v148_v59  ;;  %v916_v15 = vmul.f32 %v868_v20, %v819_v63  ;;  %v469_v24 = vsel %vm1621_vm9, %v1629_v5, %v463_v56 }
  0x55   :  { %1010 = vst [vmem:[#allocation7 + $0x28] sm:$0xff] %v962_v47  ;;  %vm1672_vm10 = vcmp.lt.f32.partialorder %v476_v25, 0.0004427343  ;;  %v204_v49 = vand.u32 2147483647, %v1659_v18  ;;  %v821_v59 = vadd.f32 %v469_v24, %v149_v60  ;;  %v251_v13 = vsub.f32 0.0, %v203_v16 }
  0x56   :  { %1011 = vst [vmem:[#allocation7 + $0x30] sm:$0xff] %v963_v29  ;;  %v917_v28 = vmul.f32 %v869_v45, %v820_v1  ;;  %v472_v35 = vmul.f32 0.6931472, %v1203_v8  ;;  %v312_v10 = vmul.f32 1.442695, %v250_v21  ;;  %v964_v27 = vadd.f32 %v916_v15, %v50_v19  ;;  %v1688_v25 = vld [vmem:[#allocation2 + $0x210] sm:$0xff] }
  0x57   :  { %v1679_v11 = vpop.eup %1204  ;;  %v252_v5 = vsub.f32 0.0, %v204_v49  ;;  %v918_v7 = vmul.f32 %v870_v55, %v821_v59  ;;  %v314_v12 = vmul.f32 1.442695, %v251_v13  ;;  %v205_v39 = vand.u32 2147483647, %v1684_v40  ;;  %v1705_v45 = vld [vmem:[#allocation2 + $0x228] sm:$0xff] }
  0x58   :  { %v965_v34 = vadd.f32 %v917_v28, %v51_v38  ;;  %v478_v46 = vsel %vm1672_vm10, %v475_v54, %v472_v35  ;;  %v479_v31 = vadd.f32 1.0, %v1679_v11  ;;  %1012 = vst [vmem:[#allocation7 + $0x38] sm:$0xff] %v964_v27  ;;  %1210 = vpow2.f32 %v312_v10  ;;  %v1707_v1 = vld [vmem:[#allocation2 + $0x230] sm:$0xff] }
  0x59   :  { %v822_v60 = vadd.f32 %v478_v46, %v2317_v30  ;;  %v966_v61 = vadd.f32 %v918_v7, %v52_v44  ;;  %v316_v48 = vmul.f32 1.442695, %v252_v5  ;;  %v151_v26 = vmax.f32 %v1525_v41, 0.0  ;;  %v1720_v44 = vld [vmem:[#allocation2 + $0x238] sm:$0xff] }
  0x5a   :  { %1013 = vst [vmem:[#allocation7 + $0x40] sm:$0xff] %v965_v34  ;;  %1212 = vlog2.f32 %v479_v31  ;;  %v152_v42 = vmax.f32 %v1533_v51, 0.0  ;;  %v206_v36 = vand.u32 2147483647, %v1688_v25  ;;  %v482_v23 = vmul.f32 -0.5, %v1679_v11 }
  0x5b   :  { %v919_v0 = vmul.f32 %v871_v6, %v822_v60  ;;  %1014 = vst [vmem:[#allocation7 + $0x48] sm:$0xff] %v966_v61  ;;  %1214 = vpow2.f32 %v314_v12  ;;  %v253_v33 = vsub.f32 0.0, %v205_v39  ;;  %v153_v3 = vmax.f32 %v1541_v9, 0.0 }
  0x5c   :  { %1216 = vpow2.f32 %v316_v48  ;;  %v154_v2 = vmax.f32 %v1643_v14, 0.0  ;;  %v254_v17 = vsub.f32 0.0, %v206_v36  ;;  %v485_v43 = vand.u32 2147483647, %v1679_v11 }
  0x5d   :  { %v1207_v22 = vpop.eup %1206  ;;  %v967_v37 = vadd.f32 %v919_v0, %v53_v32  ;;  %v318_v20 = vmul.f32 1.442695, %v253_v33  ;;  %v207_v54 = vand.u32 2147483647, %v1694_v52  ;;  %v155_v63 = vmax.f32 %v1653_v53, 0.0 }
  0x5e   :  { %v488_v58 = vadd.f32 1.0, %v1207_v22  ;;  %v156_v4 = vmax.f32 %v1659_v18, 0.0  ;;  %v483_v56 = vadd.f32 1.0, %v482_v23  ;;  %v491_v29 = vmul.f32 -0.5, %v1207_v22  ;;  %v872_v23 = vld [vmem:[#allocation2 + $0x358] sm:$0xff] }
  0x5f   :  { %v1209_v50 = vpop.eup %1208  ;;  %1015 = vst [vmem:[#allocation7 + $0x50] sm:$0xff] %v967_v37  ;;  %v320_v19 = vmul.f32 1.442695, %v254_v17  ;;  %v157_v21 = vmax.f32 %v1684_v40, 0.0  ;;  %v255_v16 = vsub.f32 0.0, %v207_v54  ;;  %v158_v55 = vmax.f32 %v1688_v25, 0.0 }
  0x60   :  { %1218 = vlog2.f32 %v488_v58  ;;  %v497_v47 = vadd.f32 1.0, %v1209_v50  ;;  %v208_v8 = vand.u32 2147483647, %v1699_v57  ;;  %vm1711_vm11 = vcmp.lt.f32.partialorder %v485_v43, 0.0004427343 }
  0x61   :  { %1220 = vpow2.f32 %v318_v20  ;;  %v500_v38 = vmul.f32 -0.5, %v1209_v50  ;;  %v209_v24 = vand.u32 2147483647, %v1705_v45  ;;  %v322_v62 = vmul.f32 1.442695, %v255_v16  ;;  %v1749_v16 = vld [vmem:[#allocation2 + $0x240] sm:$0xff] }
  0x62   :  { %1222 = vlog2.f32 %v497_v47  ;;  %v256_v49 = vsub.f32 0.0, %v208_v8  ;;  %v210_v28 = vand.u32 2147483647, %v1707_v1  ;;  %v484_v59 = vmul.f32 %v1679_v11, %v483_v56  ;;  %v54_v47 = vld [vmem:[#allocation2 + $0x58] sm:$0xff] }
  0x63   :  { %1224 = vpow2.f32 %v320_v19  ;;  %v492_v35 = vadd.f32 1.0, %v491_v29  ;;  %v494_v10 = vand.u32 2147483647, %v1207_v22  ;;  %v159_v27 = vmax.f32 %v1694_v52, 0.0 }
  0x64   :  { %1226 = vpow2.f32 %v322_v62  ;;  %v160_v5 = vmax.f32 %v1699_v57, 0.0  ;;  %v324_v34 = vmul.f32 1.442695, %v256_v49  ;;  %v257_v7 = vsub.f32 0.0, %v209_v24 }
  0x65   :  { %v1722_v13 = vpop.eup %1210  ;;  %v501_v6 = vadd.f32 1.0, %v500_v38  ;;  %v503_v31 = vand.u32 2147483647, %v1209_v50  ;;  %v161_v11 = vmax.f32 %v1705_v45, 0.0  ;;  %v258_v61 = vsub.f32 0.0, %v210_v28 }
  0x66   :  { %v506_v30 = vadd.f32 1.0, %v1722_v13  ;;  %1228 = vpow2.f32 %v324_v34  ;;  %v211_v32 = vand.u32 2147483647, %v1720_v44  ;;  %v493_v48 = vmul.f32 %v1207_v22, %v492_v35 }
  0x67   :  { %v1213_v46 = vpop.eup %1212  ;;  %vm1730_vm12 = vcmp.lt.f32.partialorder %v494_v10, 0.0004427343  ;;  %v509_v39 = vmul.f32 -0.5, %v1722_v13  ;;  %v512_v33 = vand.u32 2147483647, %v1722_v13  ;;  %v162_v54 = vmax.f32 %v1707_v1, 0.0 }
  0x68   :  { %v481_v60 = vmul.f32 0.6931472, %v1213_v46  ;;  %v1728_v12 = vpop.eup %1214  ;;  %1230 = vlog2.f32 %v506_v30  ;;  %v326_v17 = vmul.f32 1.442695, %v257_v7  ;;  %vm1743_vm13 = vcmp.lt.f32.partialorder %v503_v31, 0.0004427343 }
  0x69   :  { %v1735_v36 = vpop.eup %1216  ;;  %v515_v58 = vadd.f32 1.0, %v1728_v12  ;;  %v502_v56 = vmul.f32 %v1209_v50, %v501_v6  ;;  %v328_v29 = vmul.f32 1.442695, %v258_v61  ;;  %v259_v19 = vsub.f32 0.0, %v211_v32  ;;  %v873_v46 = vld [vmem:[#allocation2 + $0x360] sm:$0xff]  ;;  %v884_v1 = vld [vmem:[#allocation2 + $0x3b8] sm:$0xff] }
  0x6a   :  { %v487_v37 = vsel %vm1711_vm11, %v484_v59, %v481_v60  ;;  %v524_v20 = vadd.f32 1.0, %v1735_v36  ;;  %v510_v38 = vadd.f32 1.0, %v509_v39  ;;  %v163_v41 = vmax.f32 %v1720_v44, 0.0  ;;  %v55_v32 = vld [vmem:[#allocation2 + $0x60] sm:$0xff] }
  0x6b   :  { %v823_v22 = vadd.f32 %v487_v37, %v151_v26  ;;  %1232 = vlog2.f32 %v515_v58  ;;  %vm1752_vm14 = vcmp.lt.f32.partialorder %v512_v33, 0.0004427343  ;;  %v518_v49 = vmul.f32 -0.5, %v1728_v12  ;;  %v874_v37 = vld [vmem:[#allocation2 + $0x368] sm:$0xff] }
  0x6c   :  { %1234 = vlog2.f32 %v524_v20  ;;  %v527_v59 = vmul.f32 -0.5, %v1735_v36  ;;  %v212_v10 = vand.u32 2147483647, %v1749_v16  ;;  %v330_v31 = vmul.f32 1.442695, %v259_v19 }
  0x6d   :  { %v1219_v8 = vpop.eup %1218  ;;  %v920_v15 = vmul.f32 %v872_v23, %v823_v22  ;;  %1236 = vpow2.f32 %v326_v17  ;;  %v511_v23 = vmul.f32 %v1722_v13, %v510_v38  ;;  %v519_v0 = vadd.f32 1.0, %v518_v49  ;;  %v56_v17 = vld [vmem:[#allocation2 + $0x68] sm:$0xff] }
  0x6e   :  { %v1221_v26 = vpop.eup %1220  ;;  %v490_v24 = vmul.f32 0.6931472, %v1219_v8  ;;  %1238 = vpow2.f32 %v328_v29  ;;  %v528_v22 = vadd.f32 1.0, %v527_v59  ;;  %v530_v20 = vand.u32 2147483647, %v1735_v36 }
  0x6f   :  { %v1223_v50 = vpop.eup %1222  ;;  %v968_v28 = vadd.f32 %v920_v15, %v54_v47  ;;  %v533_v35 = vadd.f32 1.0, %v1221_v26  ;;  %v536_v60 = vmul.f32 -0.5, %v1221_v26  ;;  %v539_v43 = vand.u32 2147483647, %v1221_v26 }
  0x70   :  { %v1225_v34 = vpop.eup %1224  ;;  %v496_v7 = vsel %vm1730_vm12, %v493_v48, %v490_v24  ;;  %v499_v6 = vmul.f32 0.6931472, %v1223_v50  ;;  %v521_v48 = vand.u32 2147483647, %v1728_v12  ;;  %v520_v49 = vmul.f32 %v1728_v12, %v519_v0 }
  0x71   :  { %1016 = vst [vmem:[#allocation7 + $0x58] sm:$0xff] %v968_v28  ;;  %v824_v30 = vadd.f32 %v496_v7, %v152_v42  ;;  %1240 = vlog2.f32 %v533_v35  ;;  %v542_v61 = vadd.f32 1.0, %v1225_v34  ;;  %v1767_v33 = vpop.eup %1226  ;;  %v545_v42 = vmul.f32 -0.5, %v1225_v34 }
  0x72   :  { %v505_v39 = vsel %vm1743_vm13, %v502_v56, %v499_v6  ;;  %v551_v47 = vadd.f32 1.0, %v1767_v33  ;;  %v537_v19 = vadd.f32 1.0, %v536_v60  ;;  %vm1775_vm15 = vcmp.lt.f32.partialorder %v521_v48, 0.0004427343  ;;  %v875_v6 = vld [vmem:[#allocation2 + $0x370] sm:$0xff] }
  0x73   :  { %v921_v58 = vmul.f32 %v873_v46, %v824_v30  ;;  %v825_v51 = vadd.f32 %v505_v39, %v153_v3  ;;  %1242 = vlog2.f32 %v542_v61  ;;  %v1773_v56 = vpop.eup %1228  ;;  %v548_v9 = vand.u32 2147483647, %v1225_v34  ;;  %v879_v30 = vld [vmem:[#allocation2 + $0x390] sm:$0xff] }
  0x74   :  { %1244 = vpow2.f32 %v330_v31  ;;  %v560_v3 = vadd.f32 1.0, %v1773_v56  ;;  %v546_v50 = vadd.f32 1.0, %v545_v42  ;;  %v529_v28 = vmul.f32 %v1735_v36, %v528_v22  ;;  %v1793_v36 = vld [vmem:[#allocation2 + $0x248] sm:$0xff] }
  0x75   :  { %v969_v13 = vadd.f32 %v921_v58, %v55_v32  ;;  %v922_v29 = vmul.f32 %v874_v37, %v825_v51  ;;  %v1231_v8 = vpop.eup %1230  ;;  %1246 = vlog2.f32 %v551_v47  ;;  %vm1782_vm0 = vcmp.lt.f32.partialorder %v530_v20, 0.0004427343  ;;  %v877_v20 = vld [vmem:[#allocation2 + $0x380] sm:$0xff] }
  0x76   :  { %v508_v24 = vmul.f32 0.6931472, %v1231_v8  ;;  %1248 = vlog2.f32 %v560_v3  ;;  %v260_v35 = vsub.f32 0.0, %v212_v10  ;;  %v538_v31 = vmul.f32 %v1221_v26, %v537_v19  ;;  %v57_v26 = vld [vmem:[#allocation2 + $0x70] sm:$0xff] }
  0x77   :  { %1017 = vst [vmem:[#allocation7 + $0x60] sm:$0xff] %v969_v13  ;;  %v970_v38 = vadd.f32 %v922_v29, %v56_v17  ;;  %vm1788_vm1 = vcmp.lt.f32.partialorder %v539_v43, 0.0004427343  ;;  %v554_v12 = vmul.f32 -0.5, %v1767_v33  ;;  %vm1797_vm2 = vcmp.lt.f32.partialorder %v548_v9, 0.0004427343 }
  0x78   :  { %v1233_v7 = vpop.eup %1232  ;;  %v514_v46 = vsel %vm1752_vm14, %v511_v23, %v508_v24  ;;  %v332_v62 = vmul.f32 1.442695, %v260_v35  ;;  %v547_v23 = vmul.f32 %v1225_v34, %v546_v50  ;;  %v557_v0 = vand.u32 2147483647, %v1767_v33  ;;  %v58_v29 = vld [vmem:[#allocation2 + $0x78] sm:$0xff]  ;;  %v59_v9 = vld [vmem:[#allocation2 + $0x80] sm:$0xff] }
  0x79   :  { %1018 = vst [vmem:[#allocation7 + $0x68] sm:$0xff] %v970_v38  ;;  %v1235_v60 = vpop.eup %1234  ;;  %v826_v61 = vadd.f32 %v514_v46, %v154_v2  ;;  %v517_v10 = vmul.f32 0.6931472, %v1233_v7  ;;  %v563_v48 = vmul.f32 -0.5, %v1773_v56  ;;  %v876_v2 = vld [vmem:[#allocation2 + $0x378] sm:$0xff]  ;;  %v555_v43 = vadd.f32 1.0, %v554_v12 }
  0x7a   :  { %v1801_v39 = vpop.eup %1236  ;;  %v526_v37 = vmul.f32 0.6931472, %v1235_v60  ;;  %v213_v51 = vand.u32 2147483647, %v1793_v36  ;;  %1250 = vpow2.f32 %v332_v62  ;;  %v566_v8 = vand.u32 2147483647, %v1773_v56 }
  0x7b   :  { %v923_v58 = vmul.f32 %v875_v6, %v826_v61  ;;  %v523_v14 = vsel %vm1775_vm15, %v520_v49, %v517_v10  ;;  %v569_v17 = vadd.f32 1.0, %v1801_v39  ;;  %v1809_v42 = vpop.eup %1238  ;;  %v564_v53 = vadd.f32 1.0, %v563_v48  ;;  %v60_v10 = vld [vmem:[#allocation2 + $0x88] sm:$0xff] }
  0x7c   :  { %v827_v22 = vadd.f32 %v523_v14, %v155_v63  ;;  %v532_v34 = vsel %vm1782_vm0, %v529_v28, %v526_v37  ;;  %v578_v63 = vadd.f32 1.0, %v1809_v42  ;;  %v572_v49 = vmul.f32 -0.5, %v1801_v39 }
  0x7d   :  { %v971_v13 = vadd.f32 %v923_v58, %v57_v26  ;;  %v828_v19 = vadd.f32 %v532_v34, %v156_v4  ;;  %1252 = vlog2.f32 %v569_v17  ;;  %v575_v50 = vand.u32 2147483647, %v1801_v39  ;;  %v878_v4 = vld [vmem:[#allocation2 + $0x388] sm:$0xff]  ;;  %v1842_v58 = vld [vmem:[#allocation2 + $0x250] sm:$0xff] }
  0x7e   :  { %v1241_v47 = vpop.eup %1240  ;;  %v924_v15 = vmul.f32 %v876_v2, %v827_v22  ;;  %v261_v28 = vsub.f32 0.0, %v213_v51  ;;  %1254 = vlog2.f32 %v578_v63  ;;  %v556_v12 = vmul.f32 %v1767_v33, %v555_v43  ;;  %v61_v33 = vld [vmem:[#allocation2 + $0x90] sm:$0xff]  ;;  %v1849_v2 = vld [vmem:[#allocation2 + $0x258] sm:$0xff]  ;;  %v1865_v63 = vld [vmem:[#allocation2 + $0x268] sm:$0xff] }
  0x7f   :  { %v535_v3 = vmul.f32 0.6931472, %v1241_v47  ;;  %1019 = vst [vmem:[#allocation7 + $0x70] sm:$0xff] %v971_v13  ;;  %v925_v24 = vmul.f32 %v877_v20, %v828_v19  ;;  %vm1828_vm3 = vcmp.lt.f32.partialorder %v557_v0, 0.0004427343  ;;  %v565_v62 = vmul.f32 %v1773_v56, %v564_v53  ;;  %v1857_v47 = vld [vmem:[#allocation2 + $0x260] sm:$0xff] }
  0x80   :  { %v1243_v38 = vpop.eup %1242  ;;  %v972_v59 = vadd.f32 %v924_v15, %v58_v29  ;;  %vm1835_vm4 = vcmp.lt.f32.partialorder %v566_v8, 0.0004427343  ;;  %v573_v48 = vadd.f32 1.0, %v572_v49  ;;  %vm1844_vm5 = vcmp.lt.f32.partialorder %v575_v50, 0.0004427343  ;;  %v62_v29 = vld [vmem:[#allocation2 + $0x98] sm:$0xff] }
  0x81   :  { %v541_v18 = vsel %vm1788_vm1, %v538_v31, %v535_v3  ;;  %v544_v35 = vmul.f32 0.6931472, %v1243_v38  ;;  %v1823_v7 = vpop.eup %1244  ;;  %v973_v46 = vadd.f32 %v925_v24, %v59_v9  ;;  %v581_v56 = vmul.f32 -0.5, %v1809_v42  ;;  %v881_v8 = vld [vmem:[#allocation2 + $0x3a0] sm:$0xff] }
  0x82   :  { %v829_v6 = vadd.f32 %v541_v18, %v157_v21  ;;  %v1247_v61 = vpop.eup %1246  ;;  %1020 = vst [vmem:[#allocation7 + $0x78] sm:$0xff] %v972_v59  ;;  %v587_v40 = vadd.f32 1.0, %v1823_v7  ;;  %v334_v14 = vmul.f32 1.442695, %v261_v28  ;;  %v590_v20 = vmul.f32 -0.5, %v1823_v7  ;;  %v63_v24 = vld [vmem:[#allocation2 + $0xa0] sm:$0xff] }
  0x83   :  { %v550_v31 = vsel %vm1797_vm2, %v547_v23, %v544_v35  ;;  %1021 = vst [vmem:[#allocation7 + $0x80] sm:$0xff] %v973_v46  ;;  %v553_v0 = vmul.f32 0.6931472, %v1247_v61  ;;  %v1249_v32 = vpop.eup %1248  ;;  %v214_v43 = vand.u32 2147483647, %v1842_v58  ;;  %v582_v3 = vadd.f32 1.0, %v581_v56 }
  0x84   :  { %v926_v21 = vmul.f32 %v878_v4, %v829_v6  ;;  %v830_v37 = vadd.f32 %v550_v31, %v158_v55  ;;  %1256 = vlog2.f32 %v587_v40  ;;  %v880_v55 = vld [vmem:[#allocation2 + $0x398] sm:$0xff]  ;;  %v562_v22 = vmul.f32 0.6931472, %v1249_v32 }
  0x85   :  { %v559_v25 = vsel %vm1828_vm3, %v556_v12, %v553_v0  ;;  %1258 = vpow2.f32 %v334_v14  ;;  %v584_v15 = vand.u32 2147483647, %v1809_v42  ;;  %v215_v9 = vand.u32 2147483647, %v1849_v2  ;;  %v64_v0 = vld [vmem:[#allocation2 + $0xa8] sm:$0xff] }
  0x86   :  { %v974_v17 = vadd.f32 %v926_v21, %v60_v10  ;;  %v927_v51 = vmul.f32 %v879_v30, %v830_v37  ;;  %v831_v34 = vadd.f32 %v559_v25, %v159_v27  ;;  %v568_v19 = vsel %vm1835_vm4, %v565_v62, %v562_v22  ;;  %v1875_v10 = vld [vmem:[#allocation2 + $0x270] sm:$0xff]  ;;  %v882_v62 = vld [vmem:[#allocation2 + $0x3a8] sm:$0xff]  ;;  %v1883_v21 = vld [vmem:[#allocation2 + $0x278] sm:$0xff] }
  0x87   :  { %v832_v27 = vadd.f32 %v568_v19, %v160_v5  ;;  %v262_v53 = vsub.f32 0.0, %v214_v43  ;;  %v1867_v38 = vpop.eup %1250  ;;  %v574_v49 = vmul.f32 %v1801_v39, %v573_v48  ;;  %v593_v50 = vand.u32 2147483647, %v1823_v7  ;;  %v1897_v25 = vld [vmem:[#allocation2 + $0x280] sm:$0xff]  ;;  %v65_v43 = vld [vmem:[#allocation2 + $0xb0] sm:$0xff] }
  0x88   :  { %1022 = vst [vmem:[#allocation7 + $0x88] sm:$0xff] %v974_v17  ;;  %v975_v13 = vadd.f32 %v927_v51, %v61_v33  ;;  %v928_v52 = vmul.f32 %v880_v55, %v831_v34  ;;  %v263_v28 = vsub.f32 0.0, %v215_v9  ;;  %v216_v59 = vand.u32 2147483647, %v1857_v47  ;;  %v883_v51 = vld [vmem:[#allocation2 + $0x3b0] sm:$0xff] }
  0x89   :  { %v929_v35 = vmul.f32 %v881_v8, %v832_v27  ;;  %v591_v57 = vadd.f32 1.0, %v590_v20  ;;  %v596_v5 = vadd.f32 1.0, %v1867_v38  ;;  %v336_v6 = vmul.f32 1.442695, %v262_v53  ;;  %v1908_v53 = vld [vmem:[#allocation2 + $0x288] sm:$0xff] }
  0x8a   :  { %1023 = vst [vmem:[#allocation7 + $0x90] sm:$0xff] %v975_v13  ;;  %v1253_v18 = vpop.eup %1252  ;;  %v976_v4 = vadd.f32 %v928_v52, %v62_v29  ;;  %v217_v12 = vand.u32 2147483647, %v1865_v63  ;;  %v583_v61 = vmul.f32 %v1809_v42, %v582_v3  ;;  %v338_v39 = vmul.f32 1.442695, %v263_v28  ;;  %v1912_v28 = vld [vmem:[#allocation2 + $0x290] sm:$0xff] }
  0x8b   :  { %v571_v46 = vmul.f32 0.6931472, %v1253_v18  ;;  %v977_v60 = vadd.f32 %v929_v35, %v63_v24  ;;  %1260 = vlog2.f32 %v596_v5  ;;  %v1255_v31 = vpop.eup %1254  ;;  %vm1879_vm6 = vcmp.lt.f32.partialorder %v584_v15, 0.0004427343 }
  0x8c   :  { %1024 = vst [vmem:[#allocation7 + $0x98] sm:$0xff] %v976_v4  ;;  %1262 = vpow2.f32 %v336_v6  ;;  %v264_v40 = vsub.f32 0.0, %v216_v59  ;;  %v580_v33 = vmul.f32 0.6931472, %v1255_v31  ;;  %vm1887_vm7 = vcmp.lt.f32.partialorder %v593_v50, 0.0004427343 }
  0x8d   :  { %v577_v30 = vsel %vm1844_vm5, %v574_v49, %v571_v46  ;;  %1025 = vst [vmem:[#allocation7 + $0xa0] sm:$0xff] %v977_v60  ;;  %1264 = vpow2.f32 %v338_v39  ;;  %v592_v48 = vmul.f32 %v1823_v7, %v591_v57  ;;  %v265_v23 = vsub.f32 0.0, %v217_v12  ;;  %v66_v59 = vld [vmem:[#allocation2 + $0xb8] sm:$0xff] }
  0x8e   :  { %v833_v42 = vadd.f32 %v577_v30, %v161_v11  ;;  %v340_v32 = vmul.f32 1.442695, %v264_v40  ;;  %v218_v56 = vand.u32 2147483647, %v1875_v10  ;;  %v586_v17 = vsel %vm1879_vm6, %v583_v61, %v580_v33 }
  0x8f   :  { %v599_v45 = vmul.f32 -0.5, %v1867_v38  ;;  %v219_v11 = vand.u32 2147483647, %v1883_v21  ;;  %v834_v22 = vadd.f32 %v586_v17, %v162_v54  ;;  %v342_v7 = vmul.f32 1.442695, %v265_v23 }
  0x90   :  { %v930_v14 = vmul.f32 %v882_v62, %v833_v42  ;;  %1266 = vpow2.f32 %v340_v32  ;;  %v266_v34 = vsub.f32 0.0, %v218_v56  ;;  %v220_v9 = vand.u32 2147483647, %v1897_v25  ;;  %v885_v32 = vld [vmem:[#allocation2 + $0x3c0] sm:$0xff] }
  0x91   :  { %v1257_v55 = vpop.eup %1256  ;;  %v267_v29 = vsub.f32 0.0, %v219_v11  ;;  %v931_v8 = vmul.f32 %v883_v51, %v834_v22  ;;  %1268 = vpow2.f32 %v342_v7  ;;  %v600_v54 = vadd.f32 1.0, %v599_v45  ;;  %v1937_v11 = vld [vmem:[#allocation2 + $0x298] sm:$0xff]  ;;  %v67_v22 = vld [vmem:[#allocation2 + $0xc0] sm:$0xff] }
  0x92   :  { %v978_v20 = vadd.f32 %v930_v14, %v64_v0  ;;  %v589_v13 = vmul.f32 0.6931472, %v1257_v55  ;;  %v1901_v19 = vpop.eup %1258  ;;  %v344_v15 = vmul.f32 1.442695, %v266_v34  ;;  %v602_v27 = vand.u32 2147483647, %v1867_v38 }
  0x93   :  { %v605_v3 = vadd.f32 1.0, %v1901_v19  ;;  %v979_v24 = vadd.f32 %v931_v8, %v65_v43  ;;  %v346_v50 = vmul.f32 1.442695, %v267_v29  ;;  %v164_v18 = vmax.f32 %v1749_v16, 0.0 }
  0x94   :  { %1026 = vst [vmem:[#allocation7 + $0xa8] sm:$0xff] %v978_v20  ;;  %v595_v52 = vsel %vm1887_vm7, %v592_v48, %v589_v13  ;;  %1270 = vpow2.f32 %v344_v15  ;;  %v165_v4 = vmax.f32 %v1793_v36, 0.0  ;;  %v268_v35 = vsub.f32 0.0, %v220_v9 }
  0x95   :  { %v835_v49 = vadd.f32 %v595_v52, %v163_v41  ;;  %1272 = vlog2.f32 %v605_v3  ;;  %1027 = vst [vmem:[#allocation7 + $0xb0] sm:$0xff] %v979_v24  ;;  %v166_v5 = vmax.f32 %v1842_v58, 0.0  ;;  %v221_v46 = vand.u32 2147483647, %v1908_v53 }
  0x96   :  { %1274 = vpow2.f32 %v346_v50  ;;  %v601_v44 = vmul.f32 %v1867_v38, %v600_v54  ;;  %v167_v41 = vmax.f32 %v1849_v2, 0.0  ;;  %v348_v6 = vmul.f32 1.442695, %v268_v35 }
  0x97   :  { %v932_v57 = vmul.f32 %v884_v1, %v835_v49  ;;  %v222_v12 = vand.u32 2147483647, %v1912_v28  ;;  %vm1921_vm8 = vcmp.lt.f32.partialorder %v602_v27, 0.0004427343  ;;  %v168_v39 = vmax.f32 %v1857_v47, 0.0 }
  0x98   :  { %v1261_v60 = vpop.eup %1260  ;;  %v269_v31 = vsub.f32 0.0, %v221_v46  ;;  %v608_v26 = vmul.f32 -0.5, %v1901_v19  ;;  %1276 = vpow2.f32 %v348_v6  ;;  %v611_v42 = vand.u32 2147483647, %v1901_v19 }
  0x99   :  { %v980_v16 = vadd.f32 %v932_v57, %v66_v59  ;;  %v1263_v30 = vpop.eup %1262  ;;  %v598_v62 = vmul.f32 0.6931472, %v1261_v60  ;;  %v270_v38 = vsub.f32 0.0, %v222_v12  ;;  %v169_v37 = vmax.f32 %v1865_v63, 0.0  ;;  %v70_v12 = vld [vmem:[#allocation2 + $0xd8] sm:$0xff] }
  0x9a   :  { %v1927_v40 = vpop.eup %1264  ;;  %v614_v33 = vadd.f32 1.0, %v1263_v30  ;;  %v170_v0 = vmax.f32 %v1875_v10, 0.0  ;;  %v171_v56 = vmax.f32 %v1883_v21, 0.0  ;;  %v350_v14 = vmul.f32 1.442695, %v269_v31  ;;  %v74_v10 = vld [vmem:[#allocation2 + $0xf8] sm:$0xff] }
  0x9b   :  { %1028 = vst [vmem:[#allocation7 + $0xb8] sm:$0xff] %v980_v16  ;;  %v604_v48 = vsel %vm1921_vm8, %v601_v44, %v598_v62  ;;  %v623_v23 = vadd.f32 1.0, %v1927_v40  ;;  %v617_v51 = vmul.f32 -0.5, %v1263_v30  ;;  %v172_v45 = vmax.f32 %v1897_v25, 0.0  ;;  %v896_v25 = vld [vmem:[#allocation2 + $0x418] sm:$0xff] }
  0x9c   :  { %v836_v17 = vadd.f32 %v604_v48, %v164_v18  ;;  %1278 = vlog2.f32 %v614_v33  ;;  %v609_v7 = vadd.f32 1.0, %v608_v26  ;;  %v620_v34 = vand.u32 2147483647, %v1263_v30  ;;  %v886_v26 = vld [vmem:[#allocation2 + $0x3c8] sm:$0xff]  ;;  %v1958_v48 = vld [vmem:[#allocation2 + $0x2a0] sm:$0xff] }
  0x9d   :  { %v1267_v55 = vpop.eup %1266  ;;  %1280 = vlog2.f32 %v623_v23  ;;  %v352_v20 = vmul.f32 1.442695, %v270_v38  ;;  %vm1939_vm9 = vcmp.lt.f32.partialorder %v611_v42, 0.0004427343  ;;  %v626_v29 = vmul.f32 -0.5, %v1927_v40 }
  0x9e   :  { %v933_v43 = vmul.f32 %v885_v32, %v836_v17  ;;  %v632_v8 = vadd.f32 1.0, %v1267_v55  ;;  %v1269_v15 = vpop.eup %1268  ;;  %v629_v9 = vand.u32 2147483647, %v1927_v40  ;;  %v173_v52 = vmax.f32 %v1908_v53, 0.0  ;;  %v68_v17 = vld [vmem:[#allocation2 + $0xc8] sm:$0xff]  ;;  %v77_v53 = vld [vmem:[#allocation2 + $0x110] sm:$0xff] }
  0x9f   :  { %1282 = vpow2.f32 %v350_v14  ;;  %v223_v1 = vand.u32 2147483647, %v1937_v11  ;;  %v618_v27 = vadd.f32 1.0, %v617_v51  ;;  %v641_v3 = vadd.f32 1.0, %v1269_v15 }
  0xa0   :  { %v981_v54 = vadd.f32 %v933_v43, %v67_v22  ;;  %1284 = vlog2.f32 %v632_v8  ;;  %v610_v49 = vmul.f32 %v1901_v19, %v609_v7  ;;  %vm1948_vm10 = vcmp.lt.f32.partialorder %v620_v34, 0.0004427343 }
  0xa1   :  { %v1271_v24 = vpop.eup %1270  ;;  %v635_v59 = vmul.f32 -0.5, %v1267_v55  ;;  %1286 = vpow2.f32 %v352_v20  ;;  %v627_v35 = vadd.f32 1.0, %v626_v29  ;;  %v638_v57 = vand.u32 2147483647, %v1267_v55 }
  0xa2   :  { %v1273_v18 = vpop.eup %1272  ;;  %1029 = vst [vmem:[#allocation7 + $0xc0] sm:$0xff] %v981_v54  ;;  %1288 = vlog2.f32 %v641_v3  ;;  %v650_v46 = vadd.f32 1.0, %v1271_v24  ;;  %vm1952_vm11 = vcmp.lt.f32.partialorder %v629_v9, 0.0004427343  ;;  %v644_v60 = vmul.f32 -0.5, %v1269_v15  ;;  %v1975_v9 = vld [vmem:[#allocation2 + $0x2a8] sm:$0xff] }
  0xa3   :  { %v1275_v44 = vpop.eup %1274  ;;  %v607_v6 = vmul.f32 0.6931472, %v1273_v18  ;;  %v653_v19 = vmul.f32 -0.5, %v1271_v24  ;;  %v619_v16 = vmul.f32 %v1263_v30, %v618_v27  ;;  %v271_v31 = vsub.f32 0.0, %v223_v1 }
  0xa4   :  { %1290 = vlog2.f32 %v650_v46  ;;  %v659_v61 = vadd.f32 1.0, %v1275_v44  ;;  %v636_v38 = vadd.f32 1.0, %v635_v59  ;;  %v647_v42 = vand.u32 2147483647, %v1269_v15 }
  0xa5   :  { %v613_v62 = vsel %vm1939_vm9, %v610_v49, %v607_v6  ;;  %v662_v33 = vmul.f32 -0.5, %v1275_v44  ;;  %v1960_v32 = vpop.eup %1276  ;;  %v628_v14 = vmul.f32 %v1927_v40, %v627_v35  ;;  %vm1965_vm12 = vcmp.lt.f32.partialorder %v638_v57, 0.0004427343  ;;  %v887_v49 = vld [vmem:[#allocation2 + $0x3d0] sm:$0xff] }
  0xa6   :  { %v837_v23 = vadd.f32 %v613_v62, %v165_v4  ;;  %1292 = vlog2.f32 %v659_v61  ;;  %v645_v51 = vadd.f32 1.0, %v644_v60  ;;  %v654_v22 = vadd.f32 1.0, %v653_v19 }
  0xa7   :  { %v656_v7 = vand.u32 2147483647, %v1271_v24  ;;  %v668_v34 = vadd.f32 1.0, %v1960_v32  ;;  %v665_v43 = vand.u32 2147483647, %v1275_v44  ;;  %v637_v4 = vmul.f32 %v1267_v55, %v636_v38 }
  0xa8   :  { %v934_v20 = vmul.f32 %v886_v26, %v837_v23  ;;  %v354_v13 = vmul.f32 1.442695, %v271_v31  ;;  %v224_v29 = vand.u32 2147483647, %v1958_v48  ;;  %vm1971_vm13 = vcmp.lt.f32.partialorder %v647_v42, 0.0004427343 }
  0xa9   :  { %v1279_v36 = vpop.eup %1278  ;;  %v663_v8 = vadd.f32 1.0, %v662_v33  ;;  %1294 = vlog2.f32 %v668_v34  ;;  %v671_v3 = vmul.f32 -0.5, %v1960_v32  ;;  %v646_v18 = vmul.f32 %v1269_v15, %v645_v51  ;;  %v888_v31 = vld [vmem:[#allocation2 + $0x3d8] sm:$0xff]  ;;  %v69_v26 = vld [vmem:[#allocation2 + $0xd0] sm:$0xff]  ;;  %v889_v34 = vld [vmem:[#allocation2 + $0x3e0] sm:$0xff] }
  0xaa   :  { %v1281_v1 = vpop.eup %1280  ;;  %v982_v54 = vadd.f32 %v934_v20, %v68_v17  ;;  %v616_v27 = vmul.f32 0.6931472, %v1279_v36  ;;  %1296 = vpow2.f32 %v354_v13  ;;  %v655_v35 = vmul.f32 %v1271_v24, %v654_v22  ;;  %v2001_v17 = vld [vmem:[#allocation2 + $0x2b0] sm:$0xff]  ;;  %v71_v36 = vld [vmem:[#allocation2 + $0xe0] sm:$0xff] }
  0xab   :  { %v625_v59 = vmul.f32 0.6931472, %v1281_v1  ;;  %v272_v57 = vsub.f32 0.0, %v224_v29  ;;  %vm1982_vm14 = vcmp.lt.f32.partialorder %v656_v7, 0.0004427343  ;;  %v664_v33 = vmul.f32 %v1275_v44, %v663_v8  ;;  %v890_v1 = vld [vmem:[#allocation2 + $0x3e8] sm:$0xff] }
  0xac   :  { %v1978_v55 = vpop.eup %1282  ;;  %1030 = vst [vmem:[#allocation7 + $0xc8] sm:$0xff] %v982_v54  ;;  %v622_v46 = vsel %vm1948_vm10, %v619_v16, %v616_v27  ;;  %vm1986_vm15 = vcmp.lt.f32.partialorder %v665_v43, 0.0004427343  ;;  %v225_v19 = vand.u32 2147483647, %v1975_v9  ;;  %v672_v23 = vadd.f32 1.0, %v671_v3 }
  0xad   :  { %v1285_v61 = vpop.eup %1284  ;;  %v838_v15 = vadd.f32 %v622_v46, %v166_v5  ;;  %v631_v24 = vsel %vm1952_vm11, %v628_v14, %v625_v59  ;;  %v674_v50 = vand.u32 2147483647, %v1960_v32  ;;  %v677_v16 = vadd.f32 1.0, %v1978_v55  ;;  %v72_v3 = vld [vmem:[#allocation2 + $0xe8] sm:$0xff] }
  0xae   :  { %v1997_v62 = vpop.eup %1286  ;;  %v839_v38 = vadd.f32 %v631_v24, %v167_v41  ;;  %v634_v42 = vmul.f32 0.6931472, %v1285_v61  ;;  %v356_v51 = vmul.f32 1.442695, %v272_v57  ;;  %v273_v2 = vsub.f32 0.0, %v225_v19 }
  0xaf   :  { %v1289_v58 = vpop.eup %1288  ;;  %v935_v5 = vmul.f32 %v887_v49, %v838_v15  ;;  %1298 = vlog2.f32 %v677_v16  ;;  %v686_v14 = vadd.f32 1.0, %v1997_v62  ;;  %v226_v13 = vand.u32 2147483647, %v2001_v17  ;;  %v891_v49 = vld [vmem:[#allocation2 + $0x3f0] sm:$0xff] }
  0xb0   :  { %v936_v22 = vmul.f32 %v888_v31, %v839_v38  ;;  %v640_v7 = vsel %vm1965_vm12, %v637_v4, %v634_v42  ;;  %v643_v20 = vmul.f32 0.6931472, %v1289_v58  ;;  %v680_v30 = vmul.f32 -0.5, %v1978_v55  ;;  %v73_v15 = vld [vmem:[#allocation2 + $0xf0] sm:$0xff]  ;;  %v892_v31 = vld [vmem:[#allocation2 + $0x3f8] sm:$0xff] }
  0xb1   :  { %v1291_v41 = vpop.eup %1290  ;;  %v983_v43 = vadd.f32 %v935_v5, %v69_v26  ;;  %v840_v44 = vadd.f32 %v640_v7, %v168_v39  ;;  %1300 = vlog2.f32 %v686_v14  ;;  %vm2014_vm0 = vcmp.lt.f32.partialorder %v674_v50, 0.0004427343  ;;  %v2026_v50 = vld [vmem:[#allocation2 + $0x2b8] sm:$0xff]  ;;  %v893_v14 = vld [vmem:[#allocation2 + $0x400] sm:$0xff]  ;;  %v894_v39 = vld [vmem:[#allocation2 + $0x408] sm:$0xff] }
  0xb2   :  { %v984_v29 = vadd.f32 %v936_v22, %v70_v12  ;;  %v649_v8 = vsel %vm1971_vm13, %v646_v18, %v643_v20  ;;  %v652_v54 = vmul.f32 0.6931472, %v1291_v41  ;;  %1302 = vpow2.f32 %v356_v51  ;;  %v2037_v22 = vld [vmem:[#allocation2 + $0x2c0] sm:$0xff] }
  0xb3   :  { %v1293_v4 = vpop.eup %1292  ;;  %1031 = vst [vmem:[#allocation7 + $0xd0] sm:$0xff] %v983_v43  ;;  %v937_v27 = vmul.f32 %v889_v34, %v840_v44  ;;  %v841_v47 = vadd.f32 %v649_v8, %v169_v37  ;;  %v689_v18 = vmul.f32 -0.5, %v1997_v62  ;;  %v358_v57 = vmul.f32 1.442695, %v273_v2  ;;  %v2043_v34 = vld [vmem:[#allocation2 + $0x2c8] sm:$0xff]  ;;  %v75_v2 = vld [vmem:[#allocation2 + $0x100] sm:$0xff] }
  0xb4   :  { %1032 = vst [vmem:[#allocation7 + $0xd8] sm:$0xff] %v984_v29  ;;  %v658_v40 = vsel %vm1982_vm14, %v655_v35, %v652_v54  ;;  %v661_v59 = vmul.f32 0.6931472, %v1293_v4  ;;  %v673_v37 = vmul.f32 %v1960_v32, %v672_v23  ;;  %v681_v6 = vadd.f32 1.0, %v680_v30  ;;  %v2046_v44 = vld [vmem:[#allocation2 + $0x2d0] sm:$0xff] }
  0xb5   :  { %v985_v46 = vadd.f32 %v937_v27, %v71_v36  ;;  %v938_v19 = vmul.f32 %v890_v1, %v841_v47  ;;  %v842_v63 = vadd.f32 %v658_v40, %v170_v0  ;;  %1304 = vpow2.f32 %v358_v57 }
  0xb6   :  { %v1295_v61 = vpop.eup %1294  ;;  %v667_v24 = vsel %vm1986_vm15, %v664_v33, %v661_v59  ;;  %v274_v35 = vsub.f32 0.0, %v226_v13  ;;  %v683_v42 = vand.u32 2147483647, %v1978_v55  ;;  %v690_v60 = vadd.f32 1.0, %v689_v18 }
  0xb7   :  { %v2028_v16 = vpop.eup %1296  ;;  %1033 = vst [vmem:[#allocation7 + $0xe0] sm:$0xff] %v985_v46  ;;  %v986_v26 = vadd.f32 %v938_v19, %v72_v3  ;;  %v939_v38 = vmul.f32 %v891_v49, %v842_v63  ;;  %v843_v0 = vadd.f32 %v667_v24, %v171_v56  ;;  %v670_v32 = vmul.f32 0.6931472, %v1295_v61  ;;  %v76_v46 = vld [vmem:[#allocation2 + $0x108] sm:$0xff]  ;;  %v895_v63 = vld [vmem:[#allocation2 + $0x410] sm:$0xff] }
  0xb8   :  { %v695_v33 = vadd.f32 1.0, %v2028_v16  ;;  %v360_v23 = vmul.f32 1.442695, %v274_v35  ;;  %v227_v51 = vand.u32 2147483647, %v2026_v50  ;;  %v174_v56 = vmax.f32 %v1912_v28, 0.0 }
  0xb9   :  { %1034 = vst [vmem:[#allocation7 + $0xe8] sm:$0xff] %v986_v26  ;;  %v987_v58 = vadd.f32 %v939_v38, %v73_v15  ;;  %v940_v5 = vmul.f32 %v892_v31, %v843_v0  ;;  %v676_v12 = vsel %vm2014_vm0, %v673_v37, %v670_v32  ;;  %v692_v7 = vand.u32 2147483647, %v1997_v62  ;;  %v2076_v32 = vld [vmem:[#allocation2 + $0x2e0] sm:$0xff] }
  0xba   :  { %v844_v21 = vadd.f32 %v676_v12, %v172_v45  ;;  %1306 = vlog2.f32 %v695_v33  ;;  %v682_v41 = vmul.f32 %v1978_v55, %v681_v6  ;;  %v275_v43 = vsub.f32 0.0, %v227_v51  ;;  %v2070_v6 = vld [vmem:[#allocation2 + $0x2d8] sm:$0xff]  ;;  %v2080_v33 = vld [vmem:[#allocation2 + $0x2e8] sm:$0xff] }
  0xbb   :  { %1035 = vst [vmem:[#allocation7 + $0xf0] sm:$0xff] %v987_v58  ;;  %v988_v20 = vadd.f32 %v940_v5, %v74_v10  ;;  %1308 = vpow2.f32 %v360_v23  ;;  %vm2048_vm1 = vcmp.lt.f32.partialorder %v683_v42, 0.0004427343  ;;  %v698_v28 = vmul.f32 -0.5, %v2028_v16 }
  0xbc   :  { %v1299_v13 = vpop.eup %1298  ;;  %v941_v29 = vmul.f32 %v893_v14, %v844_v21  ;;  %v228_v45 = vand.u32 2147483647, %v2037_v22  ;;  %v691_v8 = vmul.f32 %v1997_v62, %v690_v60  ;;  %v362_v1 = vmul.f32 1.442695, %v275_v43 }
  0xbd   :  { %1036 = vst [vmem:[#allocation7 + $0xf8] sm:$0xff] %v988_v20  ;;  %v679_v36 = vmul.f32 0.6931472, %v1299_v13  ;;  %v229_v55 = vand.u32 2147483647, %v2043_v34  ;;  %v699_v37 = vadd.f32 1.0, %v698_v28 }
  0xbe   :  { %v1301_v54 = vpop.eup %1300  ;;  %v989_v30 = vadd.f32 %v941_v29, %v75_v2  ;;  %vm2056_vm2 = vcmp.lt.f32.partialorder %v692_v7, 0.0004427343  ;;  %v276_v27 = vsub.f32 0.0, %v228_v45  ;;  %v230_v3 = vand.u32 2147483647, %v2046_v44  ;;  %v2095_v13 = vld [vmem:[#allocation2 + $0x2f0] sm:$0xff] }
  0xbf   :  { %v685_v47 = vsel %vm2048_vm1, %v682_v41, %v679_v36  ;;  %v688_v40 = vmul.f32 0.6931472, %v1301_v54  ;;  %1310 = vpow2.f32 %v362_v1  ;;  %v277_v49 = vsub.f32 0.0, %v229_v55  ;;  %v2063_v62 = vpop.eup %1302  ;;  %v2102_v54 = vld [vmem:[#allocation2 + $0x2f8] sm:$0xff] }
  0xc0   :  { %1037 = vst [vmem:[#allocation7 + $0x100] sm:$0xff] %v989_v30  ;;  %v845_v59 = vadd.f32 %v685_v47, %v173_v52  ;;  %v364_v18 = vmul.f32 1.442695, %v276_v27  ;;  %v278_v57 = vsub.f32 0.0, %v230_v3  ;;  %v704_v61 = vadd.f32 1.0, %v2063_v62 }
  0xc1   :  { %v694_v19 = vsel %vm2056_vm2, %v691_v8, %v688_v40  ;;  %v366_v31 = vmul.f32 1.442695, %v277_v49  ;;  %v701_v52 = vand.u32 2147483647, %v2028_v16  ;;  %v707_v42 = vmul.f32 -0.5, %v2063_v62  ;;  %v78_v8 = vld [vmem:[#allocation2 + $0x118] sm:$0xff] }
  0xc2   :  { %v942_v15 = vmul.f32 %v894_v39, %v845_v59  ;;  %v846_v24 = vadd.f32 %v694_v19, %v174_v56  ;;  %1312 = vpow2.f32 %v364_v18  ;;  %v2072_v35 = vpop.eup %1304  ;;  %v368_v26 = vmul.f32 1.442695, %v278_v57 }
  0xc3   :  { %1314 = vlog2.f32 %v704_v61  ;;  %v713_v0 = vadd.f32 1.0, %v2072_v35  ;;  %v231_v60 = vand.u32 2147483647, %v2070_v6  ;;  %v175_v58 = vmax.f32 %v1937_v11, 0.0 }
  0xc4   :  { %v990_v38 = vadd.f32 %v942_v15, %v76_v46  ;;  %v943_v10 = vmul.f32 %v895_v63, %v846_v24  ;;  %1316 = vpow2.f32 %v366_v31  ;;  %v700_v5 = vmul.f32 %v2028_v16, %v699_v37 }
  0xc5   :  { %1318 = vlog2.f32 %v713_v0  ;;  %vm2084_vm3 = vcmp.lt.f32.partialorder %v701_v52, 0.0004427343  ;;  %v279_v51 = vsub.f32 0.0, %v231_v60  ;;  %v232_v21 = vand.u32 2147483647, %v2076_v32  ;;  %v84_v0 = vld [vmem:[#allocation2 + $0x148] sm:$0xff] }
  0xc6   :  { %1038 = vst [vmem:[#allocation7 + $0x108] sm:$0xff] %v990_v38  ;;  %v991_v23 = vadd.f32 %v943_v10, %v77_v53  ;;  %1320 = vpow2.f32 %v368_v26  ;;  %v176_v20 = vmax.f32 %v1958_v48, 0.0  ;;  %v233_v11 = vand.u32 2147483647, %v2080_v33 }
  0xc7   :  { %v1307_v12 = vpop.eup %1306  ;;  %v708_v2 = vadd.f32 1.0, %v707_v42  ;;  %v177_v16 = vmax.f32 %v1975_v9, 0.0  ;;  %v370_v43 = vmul.f32 1.442695, %v279_v51  ;;  %v716_v28 = vmul.f32 -0.5, %v2072_v35 }
  0xc8   :  { %v2089_v56 = vpop.eup %1308  ;;  %1039 = vst [vmem:[#allocation7 + $0x110] sm:$0xff] %v991_v23  ;;  %v697_v7 = vmul.f32 0.6931472, %v1307_v12  ;;  %v280_v45 = vsub.f32 0.0, %v232_v21  ;;  %v281_v36 = vsub.f32 0.0, %v233_v11  ;;  %v178_v1 = vmax.f32 %v2001_v17, 0.0 }
  0xc9   :  { %v722_v41 = vadd.f32 1.0, %v2089_v56  ;;  %v179_v55 = vmax.f32 %v2026_v50, 0.0  ;;  %v710_v4 = vand.u32 2147483647, %v2063_v62  ;;  %v234_v3 = vand.u32 2147483647, %v2095_v13 }
  0xca   :  { %v703_v29 = vsel %vm2084_vm3, %v700_v5, %v697_v7  ;;  %v372_v27 = vmul.f32 1.442695, %v280_v45  ;;  %v709_v39 = vmul.f32 %v2063_v62, %v708_v2  ;;  %v374_v49 = vmul.f32 1.442695, %v281_v36  ;;  %v79_v11 = vld [vmem:[#allocation2 + $0x120] sm:$0xff] }
  0xcb   :  { %v847_v48 = vadd.f32 %v703_v29, %v175_v58  ;;  %1322 = vlog2.f32 %v722_v41  ;;  %v717_v59 = vadd.f32 1.0, %v716_v28  ;;  %v719_v18 = vand.u32 2147483647, %v2072_v35  ;;  %v897_v58 = vld [vmem:[#allocation2 + $0x420] sm:$0xff]  ;;  %v898_v28 = vld [vmem:[#allocation2 + $0x428] sm:$0xff] }
  0xcc   :  { %v2104_v30 = vpop.eup %1310  ;;  %1324 = vpow2.f32 %v370_v43  ;;  %v282_v57 = vsub.f32 0.0, %v234_v3  ;;  %v725_v63 = vmul.f32 -0.5, %v2089_v56  ;;  %v235_v37 = vand.u32 2147483647, %v2102_v54  ;;  %v2146_v36 = vld [vmem:[#allocation5 + $0x3] sm:$0x1] }
  0xcd   :  { %v944_v47 = vmul.f32 %v896_v25, %v847_v48  ;;  %v731_v40 = vadd.f32 1.0, %v2104_v30  ;;  %1326 = vpow2.f32 %v372_v27  ;;  %vm2115_vm4 = vcmp.lt.f32.partialorder %v710_v4, 0.0004427343 }
  0xce   :  { %v180_v62 = vmax.f32 %v2037_v22, 0.0  ;;  %v181_v31 = vmax.f32 %v2043_v34, 0.0  ;;  %v728_v52 = vand.u32 2147483647, %v2089_v56  ;;  %v376_v26 = vmul.f32 1.442695, %v282_v57 }
  0xcf   :  { %v2111_v46 = vpop.eup %1312  ;;  %v992_v19 = vadd.f32 %v944_v47, %v78_v8  ;;  %1328 = vlog2.f32 %v731_v40  ;;  %v718_v10 = vmul.f32 %v2072_v35, %v717_v59  ;;  %vm2126_vm5 = vcmp.lt.f32.partialorder %v719_v18, 0.0004427343  ;;  %v80_v47 = vld [vmem:[#allocation2 + $0x128] sm:$0xff] }
  0xd0   :  { %v1315_v61 = vpop.eup %1314  ;;  %v740_v24 = vadd.f32 1.0, %v2111_v46  ;;  %1330 = vpow2.f32 %v374_v49  ;;  %v734_v42 = vmul.f32 -0.5, %v2104_v30  ;;  %v726_v5 = vadd.f32 1.0, %v725_v63 }
  0xd1   :  { %1040 = vst [vmem:[#allocation7 + $0x118] sm:$0xff] %v992_v19  ;;  %v706_v53 = vmul.f32 0.6931472, %v1315_v61  ;;  %v2123_v38 = vpop.eup %1316  ;;  %v283_v14 = vsub.f32 0.0, %v235_v37  ;;  %v182_v7 = vmax.f32 %v2046_v44, 0.0  ;;  %v183_v43 = vmax.f32 %v2070_v6, 0.0 }
  0xd2   :  { %1332 = vlog2.f32 %v740_v24  ;;  %v1319_v60 = vpop.eup %1318  ;;  %v749_v12 = vadd.f32 1.0, %v2123_v38  ;;  %vm2137_vm6 = vcmp.lt.f32.partialorder %v728_v52, 0.0004427343  ;;  %v743_v45 = vmul.f32 -0.5, %v2111_v46  ;;  %v899_v24 = vld [vmem:[#allocation2 + $0x430] sm:$0xff] }
  0xd3   :  { %v712_v23 = vsel %vm2115_vm4, %v709_v39, %v706_v53  ;;  %v2134_v51 = vpop.eup %1320  ;;  %v715_v35 = vmul.f32 0.6931472, %v1319_v60  ;;  %1334 = vpow2.f32 %v376_v26  ;;  %v727_v48 = vmul.f32 %v2089_v56, %v726_v5 }
  0xd4   :  { %v848_v21 = vadd.f32 %v712_v23, %v176_v20  ;;  %1336 = vlog2.f32 %v749_v12  ;;  %v758_v41 = vadd.f32 1.0, %v2134_v51  ;;  %v735_v20 = vadd.f32 1.0, %v734_v42 }
  0xd5   :  { %v721_v25 = vsel %vm2126_vm5, %v718_v10, %v715_v35  ;;  %v378_v4 = vmul.f32 1.442695, %v283_v14  ;;  %v737_v39 = vand.u32 2147483647, %v2104_v30  ;;  %v746_v40 = vand.u32 2147483647, %v2111_v46 }
  0xd6   :  { %v945_v29 = vmul.f32 %v897_v58, %v848_v21  ;;  %v849_v8 = vadd.f32 %v721_v25, %v177_v16  ;;  %1338 = vlog2.f32 %v758_v41  ;;  %v752_v49 = vmul.f32 -0.5, %v2123_v38  ;;  %v81_v10 = vld [vmem:[#allocation2 + $0x130] sm:$0xff]  ;;  %v2184_v35 = vld [vmem:[#allocation5 + $0x4] sm:$0x1]  ;;  %v900_v41 = vld [vmem:[#allocation2 + $0x438] sm:$0xff] }
  0xd7   :  { %1340 = vpow2.f32 %v378_v4  ;;  %v1063_v9 = vand.u32 2147483647, %v2146_v36  ;;  %v736_v56 = vmul.f32 %v2104_v30, %v735_v20  ;;  %v744_v16 = vadd.f32 1.0, %v743_v45 }
  0xd8   :  { %v1323_v27 = vpop.eup %1322  ;;  %v993_v3 = vadd.f32 %v945_v29, %v79_v11  ;;  %v946_v18 = vmul.f32 %v898_v28, %v849_v8  ;;  %v755_v19 = vand.u32 2147483647, %v2123_v38  ;;  %v761_v53 = vmul.f32 -0.5, %v2134_v51 }
  0xd9   :  { %v2154_v59 = vpop.eup %1324  ;;  %v724_v57 = vmul.f32 0.6931472, %v1323_v27  ;;  %v1066_v52 = vsub.f32 0.0, %v1063_v9  ;;  %vm2167_vm7 = vcmp.lt.f32.partialorder %v737_v39, 0.0004427343  ;;  %v753_v23 = vadd.f32 1.0, %v752_v49 }
  0xda   :  { %1041 = vst [vmem:[#allocation7 + $0x120] sm:$0xff] %v993_v3  ;;  %v767_v63 = vadd.f32 1.0, %v2154_v59  ;;  %v2160_v37 = vpop.eup %1326  ;;  %v994_v61 = vadd.f32 %v946_v18, %v80_v47  ;;  %vm2171_vm8 = vcmp.lt.f32.partialorder %v746_v40, 0.0004427343  ;;  %v764_v58 = vand.u32 2147483647, %v2134_v51 }
  0xdb   :  { %v730_v15 = vsel %vm2137_vm6, %v727_v48, %v724_v57  ;;  %v776_v5 = vadd.f32 1.0, %v2160_v37  ;;  %vm2180_vm9 = vcmp.lt.f32.partialorder %v755_v19, 0.0004427343  ;;  %v1069_v21 = vmul.f32 1.442695, %v1066_v52  ;;  %v82_v48 = vld [vmem:[#allocation2 + $0x138] sm:$0xff] }
  0xdc   :  { %v1329_v26 = vpop.eup %1328  ;;  %v850_v30 = vadd.f32 %v730_v15, %v178_v1  ;;  %1342 = vlog2.f32 %v767_v63  ;;  %1042 = vst [vmem:[#allocation7 + $0x128] sm:$0xff] %v994_v61  ;;  %v745_v1 = vmul.f32 %v2111_v46, %v744_v16  ;;  %v762_v29 = vadd.f32 1.0, %v761_v53  ;;  %v83_v16 = vld [vmem:[#allocation2 + $0x140] sm:$0xff] }
  0xdd   :  { %v733_v60 = vmul.f32 0.6931472, %v1329_v26  ;;  %v2177_v12 = vpop.eup %1330  ;;  %v770_v25 = vmul.f32 -0.5, %v2154_v59  ;;  %1344 = vlog2.f32 %v776_v5  ;;  %v754_v4 = vmul.f32 %v2123_v38, %v753_v23 }
  0xde   :  { %v947_v17 = vmul.f32 %v899_v24, %v850_v30  ;;  %v785_v45 = vadd.f32 1.0, %v2177_v12  ;;  %vm2195_vm10 = vcmp.lt.f32.partialorder %v764_v58, 0.0004427343  ;;  %1346 = vpow2.f32 %v1069_v21  ;;  %v902_v24 = vld [vmem:[#allocation2 + $0x448] sm:$0xff] }
  0xdf   :  { %v1333_v11 = vpop.eup %1332  ;;  %v739_v2 = vsel %vm2167_vm7, %v736_v56, %v733_v60  ;;  %v1064_v3 = vand.u32 2147483647, %v2184_v35  ;;  %v763_v18 = vmul.f32 %v2134_v51, %v762_v29  ;;  %v779_v57 = vmul.f32 -0.5, %v2160_v37  ;;  %v903_v60 = vld [vmem:[#allocation2 + $0x450] sm:$0xff] }
  0xe0   :  { %v995_v28 = vadd.f32 %v947_v17, %v81_v10  ;;  %v851_v46 = vadd.f32 %v739_v2, %v179_v55  ;;  %v742_v20 = vmul.f32 0.6931472, %v1333_v11  ;;  %v2192_v8 = vpop.eup %1334  ;;  %v901_v55 = vld [vmem:[#allocation2 + $0x440] sm:$0xff]  ;;  %1348 = vlog2.f32 %v785_v45  ;;  %v85_v17 = vld [vmem:[#allocation2 + $0x150] sm:$0xff] }
  0xe1   :  { %v1337_v47 = vpop.eup %1336  ;;  %v794_v40 = vadd.f32 1.0, %v2192_v8  ;;  %v771_v19 = vadd.f32 1.0, %v770_v25  ;;  %v773_v63 = vand.u32 2147483647, %v2154_v59  ;;  %v782_v22 = vand.u32 2147483647, %v2160_v37 }
  0xe2   :  { %1043 = vst [vmem:[#allocation7 + $0x130] sm:$0xff] %v995_v28  ;;  %v948_v39 = vmul.f32 %v900_v41, %v851_v46  ;;  %v748_v50 = vsel %vm2171_vm8, %v745_v1, %v742_v20  ;;  %v751_v49 = vmul.f32 0.6931472, %v1337_v47  ;;  %v184_v52 = vmax.f32 %v2076_v32, 0.0  ;;  %v2224_v1 = vld [vmem:[#allocation5 + $0x5] sm:$0x1] }
  0xe3   :  { %v852_v38 = vadd.f32 %v748_v50, %v180_v62  ;;  %v1339_v9 = vpop.eup %1338  ;;  %1350 = vlog2.f32 %v794_v40  ;;  %v788_v26 = vmul.f32 -0.5, %v2177_v12  ;;  %v1067_v10 = vsub.f32 0.0, %v1064_v3 }
  0xe4   :  { %v996_v56 = vadd.f32 %v948_v39, %v82_v48  ;;  %v757_v15 = vsel %vm2180_vm9, %v754_v4, %v751_v49  ;;  %v760_v53 = vmul.f32 0.6931472, %v1339_v9  ;;  %v2211_v62 = vpop.eup %1340  ;;  %v780_v23 = vadd.f32 1.0, %v779_v57  ;;  %v904_v48 = vld [vmem:[#allocation2 + $0x458] sm:$0xff] }
  0xe5   :  { %v949_v61 = vmul.f32 %v901_v55, %v852_v38  ;;  %v853_v51 = vadd.f32 %v757_v15, %v181_v31  ;;  %v803_v58 = vadd.f32 1.0, %v2211_v62  ;;  %v772_v31 = vmul.f32 %v2154_v59, %v771_v19  ;;  %v86_v55 = vld [vmem:[#allocation2 + $0x158] sm:$0xff] }
  0xe6   :  { %1044 = vst [vmem:[#allocation7 + $0x138] sm:$0xff] %v996_v56  ;;  %v766_v42 = vsel %vm2195_vm10, %v763_v18, %v760_v53  ;;  %v797_v32 = vmul.f32 -0.5, %v2192_v8  ;;  %vm2226_vm11 = vcmp.lt.f32.partialorder %v773_v63, 0.0004427343  ;;  %vm2230_vm12 = vcmp.lt.f32.partialorder %v782_v22, 0.0004427343 }
  0xe7   :  { %v997_v30 = vadd.f32 %v949_v61, %v83_v16  ;;  %v950_v5 = vmul.f32 %v902_v24, %v853_v51  ;;  %v854_v34 = vadd.f32 %v766_v42, %v182_v7  ;;  %1352 = vlog2.f32 %v803_v58  ;;  %v906_v51 = vld [vmem:[#allocation2 + $0x468] sm:$0xff]  ;;  %v907_v42 = vld [vmem:[#allocation2 + $0x470] sm:$0xff] }
  0xe8   :  { %v1071_v2 = vmul.f32 1.442695, %v1067_v10  ;;  %v789_v59 = vadd.f32 1.0, %v788_v26  ;;  %v781_v29 = vmul.f32 %v2160_v37, %v780_v23  ;;  %v791_v25 = vand.u32 2147483647, %v2177_v12 }
  0xe9   :  { %v1343_v14 = vpop.eup %1342  ;;  %1045 = vst [vmem:[#allocation7 + $0x140] sm:$0xff] %v997_v30  ;;  %v998_v44 = vadd.f32 %v950_v5, %v84_v0  ;;  %v951_v7 = vmul.f32 %v903_v60, %v854_v34  ;;  %v1065_v28 = vand.u32 2147483647, %v2224_v1  ;;  %v798_v4 = vadd.f32 1.0, %v797_v32  ;;  %v88_v30 = vld [vmem:[#allocation2 + $0x168] sm:$0xff]  ;;  %v89_v34 = vld [vmem:[#allocation2 + $0x170] sm:$0xff] }
  0xea   :  { %v769_v41 = vmul.f32 0.6931472, %v1343_v14  ;;  %1354 = vpow2.f32 %v1071_v2  ;;  %v1345_v46 = vpop.eup %1344  ;;  %v800_v27 = vand.u32 2147483647, %v2192_v8  ;;  %v806_v37 = vmul.f32 -0.5, %v2211_v62 }
  0xeb   :  { %1046 = vst [vmem:[#allocation7 + $0x148] sm:$0xff] %v998_v44  ;;  %v999_v20 = vadd.f32 %v951_v7, %v85_v17  ;;  %v778_v47 = vmul.f32 0.6931472, %v1345_v46  ;;  %v1068_v39 = vsub.f32 0.0, %v1065_v28  ;;  %v2243_v50 = vpop.eup %1346  ;;  %v185_v40 = vmax.f32 %v2080_v33, 0.0  ;;  %v908_v7 = vld [vmem:[#allocation2 + $0x478] sm:$0xff] }
  0xec   :  { %v775_v45 = vsel %vm2226_vm11, %v772_v31, %v769_v41  ;;  %v790_v38 = vmul.f32 %v2177_v12, %v789_v59  ;;  %v186_v49 = vmax.f32 %v2095_v13, 0.0  ;;  %vm2250_vm13 = vcmp.lt.f32.partialorder %v791_v25, 0.0004427343  ;;  %v87_v13 = vld [vmem:[#allocation2 + $0x160] sm:$0xff]  ;;  %v90_v25 = vld [vmem:[#allocation2 + $0x178] sm:$0xff] }
  0xed   :  { %v855_v3 = vadd.f32 %v775_v45, %v183_v43  ;;  %1047 = vst [vmem:[#allocation7 + $0x150] sm:$0xff] %v999_v20  ;;  %v1349_v18 = vpop.eup %1348  ;;  %v784_v6 = vsel %vm2230_vm12, %v781_v29, %v778_v47  ;;  %v905_v43 = vld [vmem:[#allocation2 + $0x460] sm:$0xff]  ;;  %v1075_v56 = vadd.f32 1.0, %v2243_v50  ;;  %v799_v33 = vmul.f32 %v2192_v8, %v798_v4 }
  0xee   :  { %v856_v16 = vadd.f32 %v784_v6, %v184_v52  ;;  %v787_v19 = vmul.f32 0.6931472, %v1349_v18  ;;  %v1073_v63 = vmul.f32 1.442695, %v1068_v39  ;;  %vm2256_vm14 = vcmp.lt.f32.partialorder %v800_v27, 0.0004427343 }
  0xef   :  { %v952_v57 = vmul.f32 %v904_v48, %v855_v3  ;;  %v807_v24 = vadd.f32 1.0, %v806_v37  ;;  %1356 = vlog2.f32 %v1075_v56  ;;  %v809_v52 = vand.u32 2147483647, %v2211_v62  ;;  %v1106_v37 = vld [vmem:[#allocation5 + $0x6] sm:$0x1] }
  0xf0   :  { %v1351_v12 = vpop.eup %1350  ;;  %v953_v53 = vmul.f32 %v905_v43, %v856_v16  ;;  %v793_v22 = vsel %vm2250_vm13, %v790_v38, %v787_v19  ;;  %1358 = vpow2.f32 %v1073_v63  ;;  %v1078_v5 = vmul.f32 -0.5, %v2243_v50 }
  0xf1   :  { %v1000_v61 = vadd.f32 %v952_v57, %v86_v55  ;;  %v796_v26 = vmul.f32 0.6931472, %v1351_v12  ;;  %v857_v8 = vadd.f32 %v793_v22, %v185_v40  ;;  %v808_v58 = vmul.f32 %v2211_v62, %v807_v24 }
  0xf2   :  { %v1001_v10 = vadd.f32 %v953_v53, %v87_v13  ;;  %v187_v31 = vmax.f32 %v2102_v54, 0.0  ;;  %vm810_vm15 = vcmp.lt.f32.partialorder %v809_v52, 0.0004427343  ;;  %v1079_v41 = vadd.f32 1.0, %v1078_v5 }
  0xf3   :  { %1048 = vst [vmem:[#allocation7 + $0x158] sm:$0xff] %v1000_v61  ;;  %v802_v0 = vsel %vm2256_vm14, %v799_v33, %v796_v26  ;;  %v954_v60 = vmul.f32 %v906_v51, %v857_v8  ;;  %v1081_v62 = vand.u32 2147483647, %v2243_v50  ;;  %v1060_v45 = vmax.f32 %v2146_v36, 0.0 }
  0xf4   :  { %v858_v23 = vadd.f32 %v802_v0, %v186_v49  ;;  %v1353_v17 = vpop.eup %1352  ;;  %1049 = vst [vmem:[#allocation7 + $0x160] sm:$0xff] %v1001_v10  ;;  %v1080_v28 = vmul.f32 %v2243_v50, %v1079_v41 }
  0xf5   :  { %v1002_v32 = vadd.f32 %v954_v60, %v88_v30  ;;  %v805_v21 = vmul.f32 0.6931472, %v1353_v17  ;;  %vm2271_vm0 = vcmp.lt.f32.partialorder %v1081_v62, 0.0004427343 }
  0xf6   :  { %v955_v14 = vmul.f32 %v907_v42, %v858_v23 }
  0xf7   :  { %v1355_v11 = vpop.eup %1354  ;;  %1050 = vst [vmem:[#allocation7 + $0x168] sm:$0xff] %v1002_v32  ;;  %v811_v44 = vsel %vm810_vm15, %v808_v58, %v805_v21 }
  0xf8   :  { %v1003_v2 = vadd.f32 %v955_v14, %v89_v34  ;;  %v1084_v59 = vadd.f32 1.0, %v1355_v11  ;;  %v859_v29 = vadd.f32 %v811_v44, %v187_v31  ;;  %v1087_v27 = vmul.f32 -0.5, %v1355_v11 }
  0xfa   :  { %1051 = vst [vmem:[#allocation7 + $0x170] sm:$0xff] %v1003_v2  ;;  %1360 = vlog2.f32 %v1084_v59  ;;  %v956_v54 = vmul.f32 %v908_v7, %v859_v29 }
  0xfc   :  { %v1357_v46 = vpop.eup %1356  ;;  %v1004_v20 = vadd.f32 %v956_v54, %v90_v25 }
  0xfd   :  { %v1077_v4 = vmul.f32 0.6931472, %v1357_v46  ;;  %v1359_v3 = vpop.eup %1358 }
  0xfe   :  { %1052 = vst [vmem:[#allocation7 + $0x178] sm:$0xff] %v1004_v20  ;;  %v1093_v39 = vadd.f32 1.0, %v1359_v3 }
  0xff   :  { %v1083_v47 = vsel %vm2271_vm0, %v1080_v28, %v1077_v4 }
 0x100   :  { %1415 = shalt.err (!%p1412_p0)
}
 0x101   :  { %1129 = dma.vmem_to_hbm [thread:$0]  %s1124_s1, 6144, %s2293_s2, [#allocation4], %s1453_s15, %s1453_s15, %s1454_s16   ;;  %v1102_v36 = vadd.f32 %v1083_v47, %v1060_v45  ;;  %v1053_v50 = vld [vmem:[#allocation5] sm:$0x1]  ;;  %v1088_v55 = vadd.f32 1.0, %v1087_v27  ;;  %1362 = vlog2.f32 %v1093_v39  ;;  %v1096_v57 = vmul.f32 -0.5, %v1359_v3 }
 0x102   :  { %v1090_v38 = vand.u32 2147483647, %v1355_v11  ;;  %v1061_v43 = vmax.f32 %v2184_v35, 0.0  ;;  %v1107_v16 = vld [vmem:[#allocation5 + $0x7] sm:$0x1]  ;;  %v1062_v53 = vmax.f32 %v2224_v1, 0.0 }
 0x103   :  { %v1109_v40 = vmul.f32 %v1106_v37, %v1102_v36  ;;  %v1089_v18 = vmul.f32 %v1355_v11, %v1088_v55  ;;  %v1097_v19 = vadd.f32 1.0, %v1096_v57  ;;  %v1099_v63 = vand.u32 2147483647, %v1359_v3  ;;  %v1054_v12 = vld [vmem:[#allocation5 + $0x1] sm:$0x1]  ;;  %s1459_s2 = smov [#allocation8]  }
 0x104   :  { %vm1091_vm1 = vcmp.lt.f32.partialorder %v1090_v38, 0.0004427343  ;;  %v1108_v26 = vld [vmem:[#allocation5 + $0x8] sm:$0x1]  ;;  %v1055_v52 = vld [vmem:[#allocation5 + $0x2] sm:$0x1] }
 0x105   :  { %v1112_v49 = vadd.f32 %v1109_v40, %v1053_v50  ;;  %v1098_v13 = vmul.f32 %v1359_v3, %v1097_v19  ;;  %vm1100_vm2 = vcmp.lt.f32.partialorder %v1099_v63, 0.0004427343  ;;  %s1135_s30 = sshll.u32 %s1459_s2, 4  ;;  %s1136_s30 = int_to_ptr.vmem [resolvable:$true] %s1135_s30 }
 0x106   :  { %s1424_s4 = scalar_lea.vmem %s1136_s30, 48  ;;  %s1428_s5 = scalar_lea.vmem %s1136_s30, 64 }
 0x107   :  { %v1361_v6 = vpop.eup %1360  ;;  %1115 = vst [vmem:[#allocation8] sm:$0x1] %v1112_v49  ;;  %p1425_p1 = scmp.ne.s32.totalorder %s1136_s30, %s1424_s4  ;;  %p1429_p2 = scmp.lt.s32.totalorder %s1136_s30, %s1136_s30 }
 0x108   :  { %v1086_v9 = vmul.f32 0.6931472, %v1361_v6  ;;  %p1430_p3 = scmp.lt.s32.totalorder %s1428_s5, %s1424_s4 }
 0x10a   :  { %v1092_v56 = vsel %vm1091_vm1, %v1089_v18, %v1086_v9  ;;  %p1431_p4 = por %p1430_p3, %p1429_p2 }
 0x10b   :  { %v1103_v33 = vadd.f32 %v1092_v56, %v1061_v43 }
 0x10c   :  { %p1432_p5 = pnand %p1431_p4, %p1425_p1 }
 0x10d   :  { %v1110_v61 = vmul.f32 %v1107_v16, %v1103_v33 }
 0x10e   :  { %v1363_v15 = vpop.eup %1362 }
 0x10f   :  { %v1113_v24 = vadd.f32 %v1110_v61, %v1054_v12  ;;  %v1095_v22 = vmul.f32 0.6931472, %v1363_v15 }
 0x111   :  { %1116 = vst [vmem:[#allocation8 + $0x1] sm:$0x1] %v1113_v24  ;;  %v1101_v51 = vsel %vm1100_vm2, %v1098_v13, %v1095_v22 }
 0x112   :  { %v1104_v35 = vadd.f32 %v1101_v51, %v1062_v53 }
 0x114   :  { %v1111_v8 = vmul.f32 %v1108_v26, %v1104_v35 }
 0x116   :  { %v1114_v10 = vadd.f32 %v1111_v8, %v1055_v52 }
 0x118   :  { %1117 = vst [vmem:[#allocation8 + $0x2] sm:$0x1] %v1114_v10 }
 0x119   :  { %1435 = shalt.err (!%p1432_p5)
}
 0x11a   :  { %1141 = dma.vmem_to_hbm [thread:$0]  %s1136_s30, 48, %s2294_s3, [#allocation9], %s1456_s23, %s1456_s23, %s1457_s24  }
 0x11b   :  { %1448 = dma.done.wait [#allocation4], 6144  }
 0x11c   :  { %1449 = vsyncadd [#allocation4], 4294961152 }
 0x11d   :  { %1450 = dma.done.wait [#allocation9], 48  }
 0x11e   :  { %1451 = vsyncadd [#allocation9], 4294967248 }
 0x11f   :  { %1148 = vsyncpa [#allocation3], 1 }
 0x120   :  { %1149 = vsyncpa [#allocation6], 1 }
 0x121   :  { %1150 = vsyncpa [#allocation4], 1 }
 0x122   :  { %1151 = vsyncpa [#allocation9], 1 }

</bundles_post_ra>
